<compile_context>
chip_gen: v5e
topology: v5e:2x2
jax: 0.10.0
libtpu: 0.0.40
codegen_flags: <defaults>
</compile_context>

<pallas_src>
import functools

import jax
import jax.numpy as jnp
from jax.experimental import pallas as pl
from jax.experimental.pallas import tpu as pltpu


# ----------------------------- Pallas kernel (one sample per grid step) -----------------------------
def cnn_kernel(x_ref,      # (1, 4, C_in*7, 28)  input rows split by (row % 4), W on lanes
               t1_ref,     # (C_in*5, 28, 240)   conv1 banded-Toeplitz, cols = par*120 + co*12 + j
               b1_ref,     # (1, 120)            conv1 bias, pre-broadcast (lane = co*12 + j)
               t2_ref,     # (5, 120, 160)       conv2 banded-Toeplitz, rows = c*12 + wx, cols = par*80 + f*4 + j
               b2_ref,     # (1, 80)             conv2 bias, pre-broadcast (lane = f*4 + j)
               wfc1_ref,   # (4, 80, 50)         fc1 weights per pooled row h: [h, f*4+w, out]
               bfc1_ref,   # (1, 50)
               wfc2_ref,   # (50, OUT_PAD)       fc2 (zero-padded lanes)
               bfc2_ref,   # (1, OUT_PAD)
               out_ref):   # (1, 1, OUT_PAD)
    f32 = jnp.float32
    C_in = t1_ref.shape[0] // 5

    # ---- conv1: banded-Toeplitz matmuls. 4 accumulators = (pooled-row parity) x (H-pool member).
    # a[s][u, :] accumulates conv1 output row 4*u + s (s=0..3, u=0..5), all 10 channels x 24 cols.
    a = [jnp.zeros((6, 240), f32) for _ in range(4)]
    for ci in range(C_in):
        for dy in range(5):
            w = t1_ref[ci * 5 + dy]                                        # (28, 240)
            for s in range(4):
                r = dy + s                                                 # needed x rows: 4u + r
                xs = x_ref[0, r % 4, pl.ds(ci * 7 + r // 4, 6), :]         # (6, 28) contiguous slice
                a[s] = a[s] + jnp.dot(xs, w, preferred_element_type=f32)

    # H-pool (rows 4u vs 4u+1 -> even pooled rows; 4u+2 vs 4u+3 -> odd pooled rows)
    pme = jnp.maximum(a[0], a[1])                                          # (6, 240)
    pmo = jnp.maximum(a[2], a[3])                                          # (6, 240)
    # W-pool: even-ox columns live in lanes [:120], odd-ox in [120:]; then bias + relu.
    b1 = b1_ref[...]
    p1e = jnp.maximum(jnp.maximum(pme[:, :120], pme[:, 120:]) + b1, 0.0)   # pooled rows 0,2,..,10
    p1o = jnp.maximum(jnp.maximum(pmo[:, :120], pmo[:, 120:]) + b1, 0.0)   # pooled rows 1,3,..,11
    p1 = (p1e, p1o)                                                        # lane = c*12 + w

    # ---- conv2: same trick. Top/bottom of each H-pool pair in separate accumulators.
    g_top = jnp.zeros((4, 160), f32)
    g_bot = jnp.zeros((4, 160), f32)
    for dy in range(5):
        w = t2_ref[dy]                                                     # (120, 160)
        rt = p1[dy % 2][dy // 2: dy // 2 + 4, :]                           # p1 rows 2*i2 + dy
        rb = p1[(dy + 1) % 2][(dy + 1) // 2: (dy + 1) // 2 + 4, :]         # p1 rows 2*i2 + 1 + dy
        g_top = g_top + jnp.dot(rt, w, preferred_element_type=f32)
        g_bot = g_bot + jnp.dot(rb, w, preferred_element_type=f32)
    # TODO(synk): Dropout2d (after conv2) and Dropout (after fc1) are inference-mode identities here.
    g = jnp.maximum(g_top, g_bot)                                          # (4, 160) H-pooled
    act = jnp.maximum(jnp.maximum(g[:, :80], g[:, 80:]) + b2_ref[...], 0.0)  # (4, 80), lane = f*4 + w

    # ---- fc1 (+relu) and fc2; lane-dense padded output ----
    h1 = bfc1_ref[...]                                                     # (1, 50)
    for r in range(4):
        h1 = h1 + jnp.dot(act[r:r + 1, :], wfc1_ref[r],
                          preferred_element_type=f32)
    h1 = jnp.maximum(h1, 0.0)
    out = jnp.dot(h1, wfc2_ref[...], preferred_element_type=f32) + bfc2_ref[...]
    out_ref[...] = out.reshape(out_ref.shape).astype(out_ref.dtype)


# ----------------------------- wrapper: layout + Toeplitz construction -----------------------------
def _build_conv1_toeplitz(w1):
    """w1: (10, C_in, 5, 5) -> (C_in*5, 28, 240); T[ci*5+dy, k, par*120+co*12+j] = w1[co,ci,dy,k-ox], ox=2j+par."""
    Cout, C_in, K, _ = w1.shape
    OW = 24
    k = jnp.arange(28)
    ox = jnp.arange(OW)
    d = k[:, None] - ox[None, :]                               # (28, 24)
    taps = w1[:, :, :, jnp.clip(d, 0, K - 1)]                  # (Cout, C_in, K, 28, 24)
    taps = jnp.where((d >= 0) & (d < K), taps, 0.0)
    t = jnp.transpose(taps, (1, 2, 3, 0, 4))                   # (C_in, dy, k, co, ox)
    t = t.reshape(C_in, K, 28, Cout, OW // 2, 2)               # ox = j*2 + par
    t = jnp.transpose(t, (0, 1, 2, 5, 3, 4))                   # (C_in, dy, k, par, co, j)
    return t.reshape(C_in * K, 28, 2 * Cout * (OW // 2)).astype(jnp.float32)


def _build_conv2_toeplitz(w2):
    """w2: (20, 10, 5, 5) -> (5, 120, 160); T[dy, c*12+wx, par*80+f*4+j] = w2[f,c,dy,wx-ox], ox=2j+par."""
    F, C, K, _ = w2.shape
    IW, OW = 12, 8
    wx = jnp.arange(IW)
    ox = jnp.arange(OW)
    d = wx[:, None] - ox[None, :]                              # (12, 8)
    taps = w2[:, :, :, jnp.clip(d, 0, K - 1)]                  # (F, C, K, 12, 8)
    taps = jnp.where((d >= 0) & (d < K), taps, 0.0)
    t = jnp.transpose(taps, (2, 1, 3, 0, 4))                   # (dy, c, wx, f, ox)
    t = t.reshape(K, C, IW, F, OW // 2, 2)
    t = jnp.transpose(t, (0, 1, 2, 5, 3, 4))                   # (dy, c, wx, par, f, j)
    return t.reshape(K, C * IW, 2 * F * (OW // 2)).astype(jnp.float32)


@functools.partial(jax.jit, static_argnums=(2,))
def cnn_forward(x, params, num_classes):
    """x: (B, C_in, 28, 28) float32. Returns (B, num_classes) float32."""
    B, C_in, H, W = x.shape
    assert H == 28 and W == 28, "fc1(320, 50) implies 28x28 spatial inputs"
    out_pad = max(128, ((num_classes + 127) // 128) * 128)

    # Input rows split by (row % 4) so conv1 never needs strided/masked accesses.
    xs = x.astype(jnp.float32).reshape(B, C_in, 7, 4, 28)
    xs = jnp.transpose(xs, (0, 3, 1, 2, 4)).reshape(B, 4, C_in * 7, 28)

    t1 = _build_conv1_toeplitz(params["conv1_w"].astype(jnp.float32))      # (C_in*5, 28, 240)
    t2 = _build_conv2_toeplitz(params["conv2_w"].astype(jnp.float32))      # (5, 120, 160)
    b1v = jnp.repeat(params["conv1_b"].astype(jnp.float32), 12).reshape(1, 120)
    b2v = jnp.repeat(params["conv2_b"].astype(jnp.float32), 4).reshape(1, 80)
    # fc1 rows are in PyTorch (c, h, w) flatten order; regroup to per-pooled-row blocks [h, f*4+w, out].
    wfc1 = (params["fc1_w"].astype(jnp.float32)
            .reshape(50, 20, 4, 4).transpose(2, 1, 3, 0).reshape(4, 80, 50))
    bfc1 = params["fc1_b"].astype(jnp.float32).reshape(1, 50)
    wfc2 = jnp.zeros((50, out_pad), jnp.float32).at[:, :num_classes].set(
        params["fc2_w"].astype(jnp.float32).T)
    bfc2 = jnp.zeros((1, out_pad), jnp.float32).at[:, :num_classes].set(
        params["fc2_b"].astype(jnp.float32))

    flops = int(2 * B * (24 * 24 * 25 * C_in * 10 + 8 * 8 * 25 * 10 * 20
                         + 320 * 50 + 50 * num_classes))
    bytes_accessed = int(4 * (xs.size + t1.size + t2.size + b1v.size + b2v.size
                              + wfc1.size + bfc1.size + wfc2.size + bfc2.size
                              + B * out_pad))

    out3 = pl.pallas_call(
        cnn_kernel,
        out_shape=jax.ShapeDtypeStruct((B, 1, out_pad), jnp.float32),
        grid=(B,),
        in_specs=[
            pl.BlockSpec((1, 4, C_in * 7, 28), lambda b: (b, 0, 0, 0)),
            pl.BlockSpec((C_in * 5, 28, 240), lambda b: (0, 0, 0)),
            pl.BlockSpec((1, 120), lambda b: (0, 0)),
            pl.BlockSpec((5, 120, 160), lambda b: (0, 0, 0)),
            pl.BlockSpec((1, 80), lambda b: (0, 0)),
            pl.BlockSpec((4, 80, 50), lambda b: (0, 0, 0)),
            pl.BlockSpec((1, 50), lambda b: (0, 0)),
            pl.BlockSpec((50, out_pad), lambda b: (0, 0)),
            pl.BlockSpec((1, out_pad), lambda b: (0, 0)),
        ],
        out_specs=pl.BlockSpec((1, 1, out_pad), lambda b: (b, 0, 0)),
        compiler_params=pltpu.CompilerParams(dimension_semantics=("parallel",)),
        cost_estimate=pl.CostEstimate(flops=flops, transcendentals=0,
                                      bytes_accessed=bytes_accessed),
    )(xs, t1, b1v, t2, b2v, wfc1, bfc1, wfc2, bfc2)
    return out3.reshape(B, out_pad)[:, :num_classes]


# ----------------------------- pure-JAX reference -----------------------------
def _maxpool2(y):  # y: (B, C, H, W), 2x2 stride-2
    return jnp.maximum(
        jnp.maximum(y[:, :, 0::2, 0::2], y[:, :, 0::2, 1::2]),
        jnp.maximum(y[:, :, 1::2, 0::2], y[:, :, 1::2, 1::2]))


def reference_forward(x, params):
    dn = ("NCHW", "OIHW", "NCHW")
    hi = jax.lax.Precision.HIGHEST
    y = jax.lax.conv_general_dilated(x, params["conv1_w"], (1, 1), "VALID",
                                     dimension_numbers=dn, precision=hi)
    y = y + params["conv1_b"][None, :, None, None]
    y = jax.nn.relu(_maxpool2(y))
    y = jax.lax.conv_general_dilated(y, params["conv2_w"], (1, 1), "VALID",
                                     dimension_numbers=dn, precision=hi)
    y = y + params["conv2_b"][None, :, None, None]
    y = jax.nn.relu(_maxpool2(y))
    y = y.reshape(y.shape[0], -1)                      # (B, 320), (c,h,w) order
    y = jax.nn.relu(jnp.dot(y, params["fc1_w"].T, precision=hi) + params["fc1_b"])
    y = jnp.dot(y, params["fc2_w"].T, precision=hi) + params["fc2_b"]
    return y


def init_params(key, num_channels, num_classes):
    ks = jax.random.split(key, 8)

    def u(k, shape, fan_in):
        b = 1.0 / (fan_in ** 0.5)
        return jax.random.uniform(k, shape, jnp.float32, -b, b)

    return {
        "conv1_w": u(ks[0], (10, num_channels, 5, 5), num_channels * 25),
        "conv1_b": u(ks[1], (10,), num_channels * 25),
        "conv2_w": u(ks[2], (20, 10, 5, 5), 250),
        "conv2_b": u(ks[3], (20,), 250),
        "fc1_w": u(ks[4], (50, 320), 320),
        "fc1_b": u(ks[5], (50,), 320),
        "fc2_w": u(ks[6], (num_classes, 50), 50),
        "fc2_b": u(ks[7], (num_classes,), 50),
    }


if __name__ == "__main__":
    B, C_in, num_classes = 2, 1, 10   # 28x28 input is implied by fc1's 320 = 20*4*4

    key = jax.random.PRNGKey(0)
    k_param, k_x = jax.random.split(key)
    params = init_params(k_param, C_in, num_classes)
    x = jax.random.normal(k_x, (B, C_in, 28, 28), jnp.float32)

    out = cnn_forward(x, params, num_classes)
    out = jax.block_until_ready(out)

    ref = reference_forward(x, params)
    assert out.shape == (B, num_classes)
    err = float(jnp.max(jnp.abs(out - ref)))
    assert jnp.allclose(out, ref, atol=5e-3, rtol=5e-3), f"mismatch vs reference (max|diff|={err})"

    print("KERNEL_OK")
</pallas_src>

<mosaic_0001>
module attributes {stable_mosaic.version = 11 : i64} {
  func.func @cnn_kernel(%arg0: i32, %arg1: memref<1x4x7x28xf32, #tpu.memory_space<vmem>>, %arg2: memref<5x28x240xf32, #tpu.memory_space<vmem>>, %arg3: memref<1x120xf32, #tpu.memory_space<vmem>>, %arg4: memref<5x120x160xf32, #tpu.memory_space<vmem>>, %arg5: memref<1x80xf32, #tpu.memory_space<vmem>>, %arg6: memref<4x80x50xf32, #tpu.memory_space<vmem>>, %arg7: memref<1x50xf32, #tpu.memory_space<vmem>>, %arg8: memref<50x128xf32, #tpu.memory_space<vmem>>, %arg9: memref<1x128xf32, #tpu.memory_space<vmem>>, %arg10: memref<1x1x128xf32, #tpu.memory_space<vmem>>) attributes {dimension_semantics = [#tpu.dimension_semantics<parallel>], iteration_bounds = array<i64: 2>, scalar_prefetch = 0 : i64, scratch_operands = 0 : i64, tpu.core_type = #tpu.core_type<tc>, window_params = [{transform_indices = @transform_0, window_bounds = array<i64: 1, 4, 7, 28>}, {pipeline_mode = #tpu.pipeline_mode<synchronous>, transform_indices = @transform_1, window_bounds = array<i64: 5, 28, 240>}, {pipeline_mode = #tpu.pipeline_mode<synchronous>, transform_indices = @transform_2, window_bounds = array<i64: 1, 120>}, {pipeline_mode = #tpu.pipeline_mode<synchronous>, transform_indices = @transform_3, window_bounds = array<i64: 5, 120, 160>}, {pipeline_mode = #tpu.pipeline_mode<synchronous>, transform_indices = @transform_4, window_bounds = array<i64: 1, 80>}, {pipeline_mode = #tpu.pipeline_mode<synchronous>, transform_indices = @transform_5, window_bounds = array<i64: 4, 80, 50>}, {pipeline_mode = #tpu.pipeline_mode<synchronous>, transform_indices = @transform_6, window_bounds = array<i64: 1, 50>}, {pipeline_mode = #tpu.pipeline_mode<synchronous>, transform_indices = @transform_7, window_bounds = array<i64: 50, 128>}, {pipeline_mode = #tpu.pipeline_mode<synchronous>, transform_indices = @transform_8, window_bounds = array<i64: 1, 128>}, {transform_indices = @transform_9, window_bounds = array<i64: 1, 1, 128>}]} {
    %cst = arith.constant 0.000000e+00 : f32
    %0 = vector.broadcast %cst : f32 to vector<6x240xf32>
    %cst_0 = arith.constant 0.000000e+00 : f32
    %1 = vector.broadcast %cst_0 : f32 to vector<6x240xf32>
    %cst_1 = arith.constant 0.000000e+00 : f32
    %2 = vector.broadcast %cst_1 : f32 to vector<6x240xf32>
    %cst_2 = arith.constant 0.000000e+00 : f32
    %3 = vector.broadcast %cst_2 : f32 to vector<6x240xf32>
    %c0 = arith.constant 0 : index
    %c0_3 = arith.constant 0 : index
    %c0_4 = arith.constant 0 : index
    %4 = vector.load %arg2[%c0, %c0_3, %c0_4] : memref<5x28x240xf32, #tpu.memory_space<vmem>>, vector<1x28x240xf32>
    %5 = vector.shape_cast %4 : vector<1x28x240xf32> to vector<28x240xf32>
    %c0_5 = arith.constant 0 : index
    %c0_6 = arith.constant 0 : index
    %c0_7 = arith.constant 0 : index
    %c0_8 = arith.constant 0 : index
    %6 = vector.load %arg1[%c0_5, %c0_6, %c0_7, %c0_8] : memref<1x4x7x28xf32, #tpu.memory_space<vmem>>, vector<1x1x6x28xf32>
    %7 = vector.shape_cast %6 : vector<1x1x6x28xf32> to vector<6x28xf32>
    %cst_9 = arith.constant dense<0.000000e+00> : vector<6x240xf32>
    %8 = tpu.matmul %7, %5, %cst_9 {dimension_numbers = #tpu.dot_dimension_numbers<[1], [0], [0], [1], [0, 0, 1, 1], [], []>} : vector<6x28xf32>, vector<28x240xf32>, vector<6x240xf32> -> vector<6x240xf32>
    %9 = arith.addf %0, %8 : vector<6x240xf32>
    %c0_10 = arith.constant 0 : index
    %c1 = arith.constant 1 : index
    %c0_11 = arith.constant 0 : index
    %c0_12 = arith.constant 0 : index
    %10 = vector.load %arg1[%c0_10, %c1, %c0_11, %c0_12] : memref<1x4x7x28xf32, #tpu.memory_space<vmem>>, vector<1x1x6x28xf32>
    %11 = vector.shape_cast %10 : vector<1x1x6x28xf32> to vector<6x28xf32>
    %cst_13 = arith.constant dense<0.000000e+00> : vector<6x240xf32>
    %12 = tpu.matmul %11, %5, %cst_13 {dimension_numbers = #tpu.dot_dimension_numbers<[1], [0], [0], [1], [0, 0, 1, 1], [], []>} : vector<6x28xf32>, vector<28x240xf32>, vector<6x240xf32> -> vector<6x240xf32>
    %13 = arith.addf %1, %12 : vector<6x240xf32>
    %c0_14 = arith.constant 0 : index
    %c2 = arith.constant 2 : index
    %c0_15 = arith.constant 0 : index
    %c0_16 = arith.constant 0 : index
    %14 = vector.load %arg1[%c0_14, %c2, %c0_15, %c0_16] : memref<1x4x7x28xf32, #tpu.memory_space<vmem>>, vector<1x1x6x28xf32>
    %15 = vector.shape_cast %14 : vector<1x1x6x28xf32> to vector<6x28xf32>
    %cst_17 = arith.constant dense<0.000000e+00> : vector<6x240xf32>
    %16 = tpu.matmul %15, %5, %cst_17 {dimension_numbers = #tpu.dot_dimension_numbers<[1], [0], [0], [1], [0, 0, 1, 1], [], []>} : vector<6x28xf32>, vector<28x240xf32>, vector<6x240xf32> -> vector<6x240xf32>
    %17 = arith.addf %2, %16 : vector<6x240xf32>
    %c0_18 = arith.constant 0 : index
    %c3 = arith.constant 3 : index
    %c0_19 = arith.constant 0 : index
    %c0_20 = arith.constant 0 : index
    %18 = vector.load %arg1[%c0_18, %c3, %c0_19, %c0_20] : memref<1x4x7x28xf32, #tpu.memory_space<vmem>>, vector<1x1x6x28xf32>
    %19 = vector.shape_cast %18 : vector<1x1x6x28xf32> to vector<6x28xf32>
    %cst_21 = arith.constant dense<0.000000e+00> : vector<6x240xf32>
    %20 = tpu.matmul %19, %5, %cst_21 {dimension_numbers = #tpu.dot_dimension_numbers<[1], [0], [0], [1], [0, 0, 1, 1], [], []>} : vector<6x28xf32>, vector<28x240xf32>, vector<6x240xf32> -> vector<6x240xf32>
    %21 = arith.addf %3, %20 : vector<6x240xf32>
    %c1_22 = arith.constant 1 : index
    %c0_23 = arith.constant 0 : index
    %c0_24 = arith.constant 0 : index
    %22 = vector.load %arg2[%c1_22, %c0_23, %c0_24] : memref<5x28x240xf32, #tpu.memory_space<vmem>>, vector<1x28x240xf32>
    %23 = vector.shape_cast %22 : vector<1x28x240xf32> to vector<28x240xf32>
    %c0_25 = arith.constant 0 : index
    %c1_26 = arith.constant 1 : index
    %c0_27 = arith.constant 0 : index
    %c0_28 = arith.constant 0 : index
    %24 = vector.load %arg1[%c0_25, %c1_26, %c0_27, %c0_28] : memref<1x4x7x28xf32, #tpu.memory_space<vmem>>, vector<1x1x6x28xf32>
    %25 = vector.shape_cast %24 : vector<1x1x6x28xf32> to vector<6x28xf32>
    %cst_29 = arith.constant dense<0.000000e+00> : vector<6x240xf32>
    %26 = tpu.matmul %25, %23, %cst_29 {dimension_numbers = #tpu.dot_dimension_numbers<[1], [0], [0], [1], [0, 0, 1, 1], [], []>} : vector<6x28xf32>, vector<28x240xf32>, vector<6x240xf32> -> vector<6x240xf32>
    %27 = arith.addf %9, %26 : vector<6x240xf32>
    %c0_30 = arith.constant 0 : index
    %c2_31 = arith.constant 2 : index
    %c0_32 = arith.constant 0 : index
    %c0_33 = arith.constant 0 : index
    %28 = vector.load %arg1[%c0_30, %c2_31, %c0_32, %c0_33] : memref<1x4x7x28xf32, #tpu.memory_space<vmem>>, vector<1x1x6x28xf32>
    %29 = vector.shape_cast %28 : vector<1x1x6x28xf32> to vector<6x28xf32>
    %cst_34 = arith.constant dense<0.000000e+00> : vector<6x240xf32>
    %30 = tpu.matmul %29, %23, %cst_34 {dimension_numbers = #tpu.dot_dimension_numbers<[1], [0], [0], [1], [0, 0, 1, 1], [], []>} : vector<6x28xf32>, vector<28x240xf32>, vector<6x240xf32> -> vector<6x240xf32>
    %31 = arith.addf %13, %30 : vector<6x240xf32>
    %c0_35 = arith.constant 0 : index
    %c3_36 = arith.constant 3 : index
    %c0_37 = arith.constant 0 : index
    %c0_38 = arith.constant 0 : index
    %32 = vector.load %arg1[%c0_35, %c3_36, %c0_37, %c0_38] : memref<1x4x7x28xf32, #tpu.memory_space<vmem>>, vector<1x1x6x28xf32>
    %33 = vector.shape_cast %32 : vector<1x1x6x28xf32> to vector<6x28xf32>
    %cst_39 = arith.constant dense<0.000000e+00> : vector<6x240xf32>
    %34 = tpu.matmul %33, %23, %cst_39 {dimension_numbers = #tpu.dot_dimension_numbers<[1], [0], [0], [1], [0, 0, 1, 1], [], []>} : vector<6x28xf32>, vector<28x240xf32>, vector<6x240xf32> -> vector<6x240xf32>
    %35 = arith.addf %17, %34 : vector<6x240xf32>
    %c0_40 = arith.constant 0 : index
    %c0_41 = arith.constant 0 : index
    %c1_42 = arith.constant 1 : index
    %c0_43 = arith.constant 0 : index
    %36 = vector.load %arg1[%c0_40, %c0_41, %c1_42, %c0_43] : memref<1x4x7x28xf32, #tpu.memory_space<vmem>>, vector<1x1x6x28xf32>
    %37 = vector.shape_cast %36 : vector<1x1x6x28xf32> to vector<6x28xf32>
    %cst_44 = arith.constant dense<0.000000e+00> : vector<6x240xf32>
    %38 = tpu.matmul %37, %23, %cst_44 {dimension_numbers = #tpu.dot_dimension_numbers<[1], [0], [0], [1], [0, 0, 1, 1], [], []>} : vector<6x28xf32>, vector<28x240xf32>, vector<6x240xf32> -> vector<6x240xf32>
    %39 = arith.addf %21, %38 : vector<6x240xf32>
    %c2_45 = arith.constant 2 : index
    %c0_46 = arith.constant 0 : index
    %c0_47 = arith.constant 0 : index
    %40 = vector.load %arg2[%c2_45, %c0_46, %c0_47] : memref<5x28x240xf32, #tpu.memory_space<vmem>>, vector<1x28x240xf32>
    %41 = vector.shape_cast %40 : vector<1x28x240xf32> to vector<28x240xf32>
    %c0_48 = arith.constant 0 : index
    %c2_49 = arith.constant 2 : index
    %c0_50 = arith.constant 0 : index
    %c0_51 = arith.constant 0 : index
    %42 = vector.load %arg1[%c0_48, %c2_49, %c0_50, %c0_51] : memref<1x4x7x28xf32, #tpu.memory_space<vmem>>, vector<1x1x6x28xf32>
    %43 = vector.shape_cast %42 : vector<1x1x6x28xf32> to vector<6x28xf32>
    %cst_52 = arith.constant dense<0.000000e+00> : vector<6x240xf32>
    %44 = tpu.matmul %43, %41, %cst_52 {dimension_numbers = #tpu.dot_dimension_numbers<[1], [0], [0], [1], [0, 0, 1, 1], [], []>} : vector<6x28xf32>, vector<28x240xf32>, vector<6x240xf32> -> vector<6x240xf32>
    %45 = arith.addf %27, %44 : vector<6x240xf32>
    %c0_53 = arith.constant 0 : index
    %c3_54 = arith.constant 3 : index
    %c0_55 = arith.constant 0 : index
    %c0_56 = arith.constant 0 : index
    %46 = vector.load %arg1[%c0_53, %c3_54, %c0_55, %c0_56] : memref<1x4x7x28xf32, #tpu.memory_space<vmem>>, vector<1x1x6x28xf32>
    %47 = vector.shape_cast %46 : vector<1x1x6x28xf32> to vector<6x28xf32>
    %cst_57 = arith.constant dense<0.000000e+00> : vector<6x240xf32>
    %48 = tpu.matmul %47, %41, %cst_57 {dimension_numbers = #tpu.dot_dimension_numbers<[1], [0], [0], [1], [0, 0, 1, 1], [], []>} : vector<6x28xf32>, vector<28x240xf32>, vector<6x240xf32> -> vector<6x240xf32>
    %49 = arith.addf %31, %48 : vector<6x240xf32>
    %c0_58 = arith.constant 0 : index
    %c0_59 = arith.constant 0 : index
    %c1_60 = arith.constant 1 : index
    %c0_61 = arith.constant 0 : index
    %50 = vector.load %arg1[%c0_58, %c0_59, %c1_60, %c0_61] : memref<1x4x7x28xf32, #tpu.memory_space<vmem>>, vector<1x1x6x28xf32>
    %51 = vector.shape_cast %50 : vector<1x1x6x28xf32> to vector<6x28xf32>
    %cst_62 = arith.constant dense<0.000000e+00> : vector<6x240xf32>
    %52 = tpu.matmul %51, %41, %cst_62 {dimension_numbers = #tpu.dot_dimension_numbers<[1], [0], [0], [1], [0, 0, 1, 1], [], []>} : vector<6x28xf32>, vector<28x240xf32>, vector<6x240xf32> -> vector<6x240xf32>
    %53 = arith.addf %35, %52 : vector<6x240xf32>
    %c0_63 = arith.constant 0 : index
    %c1_64 = arith.constant 1 : index
    %c1_65 = arith.constant 1 : index
    %c0_66 = arith.constant 0 : index
    %54 = vector.load %arg1[%c0_63, %c1_64, %c1_65, %c0_66] : memref<1x4x7x28xf32, #tpu.memory_space<vmem>>, vector<1x1x6x28xf32>
    %55 = vector.shape_cast %54 : vector<1x1x6x28xf32> to vector<6x28xf32>
    %cst_67 = arith.constant dense<0.000000e+00> : vector<6x240xf32>
    %56 = tpu.matmul %55, %41, %cst_67 {dimension_numbers = #tpu.dot_dimension_numbers<[1], [0], [0], [1], [0, 0, 1, 1], [], []>} : vector<6x28xf32>, vector<28x240xf32>, vector<6x240xf32> -> vector<6x240xf32>
    %57 = arith.addf %39, %56 : vector<6x240xf32>
    %c3_68 = arith.constant 3 : index
    %c0_69 = arith.constant 0 : index
    %c0_70 = arith.constant 0 : index
    %58 = vector.load %arg2[%c3_68, %c0_69, %c0_70] : memref<5x28x240xf32, #tpu.memory_space<vmem>>, vector<1x28x240xf32>
    %59 = vector.shape_cast %58 : vector<1x28x240xf32> to vector<28x240xf32>
    %c0_71 = arith.constant 0 : index
    %c3_72 = arith.constant 3 : index
    %c0_73 = arith.constant 0 : index
    %c0_74 = arith.constant 0 : index
    %60 = vector.load %arg1[%c0_71, %c3_72, %c0_73, %c0_74] : memref<1x4x7x28xf32, #tpu.memory_space<vmem>>, vector<1x1x6x28xf32>
    %61 = vector.shape_cast %60 : vector<1x1x6x28xf32> to vector<6x28xf32>
    %cst_75 = arith.constant dense<0.000000e+00> : vector<6x240xf32>
    %62 = tpu.matmul %61, %59, %cst_75 {dimension_numbers = #tpu.dot_dimension_numbers<[1], [0], [0], [1], [0, 0, 1, 1], [], []>} : vector<6x28xf32>, vector<28x240xf32>, vector<6x240xf32> -> vector<6x240xf32>
    %63 = arith.addf %45, %62 : vector<6x240xf32>
    %c0_76 = arith.constant 0 : index
    %c0_77 = arith.constant 0 : index
    %c1_78 = arith.constant 1 : index
    %c0_79 = arith.constant 0 : index
    %64 = vector.load %arg1[%c0_76, %c0_77, %c1_78, %c0_79] : memref<1x4x7x28xf32, #tpu.memory_space<vmem>>, vector<1x1x6x28xf32>
    %65 = vector.shape_cast %64 : vector<1x1x6x28xf32> to vector<6x28xf32>
    %cst_80 = arith.constant dense<0.000000e+00> : vector<6x240xf32>
    %66 = tpu.matmul %65, %59, %cst_80 {dimension_numbers = #tpu.dot_dimension_numbers<[1], [0], [0], [1], [0, 0, 1, 1], [], []>} : vector<6x28xf32>, vector<28x240xf32>, vector<6x240xf32> -> vector<6x240xf32>
    %67 = arith.addf %49, %66 : vector<6x240xf32>
    %c0_81 = arith.constant 0 : index
    %c1_82 = arith.constant 1 : index
    %c1_83 = arith.constant 1 : index
    %c0_84 = arith.constant 0 : index
    %68 = vector.load %arg1[%c0_81, %c1_82, %c1_83, %c0_84] : memref<1x4x7x28xf32, #tpu.memory_space<vmem>>, vector<1x1x6x28xf32>
    %69 = vector.shape_cast %68 : vector<1x1x6x28xf32> to vector<6x28xf32>
    %cst_85 = arith.constant dense<0.000000e+00> : vector<6x240xf32>
    %70 = tpu.matmul %69, %59, %cst_85 {dimension_numbers = #tpu.dot_dimension_numbers<[1], [0], [0], [1], [0, 0, 1, 1], [], []>} : vector<6x28xf32>, vector<28x240xf32>, vector<6x240xf32> -> vector<6x240xf32>
    %71 = arith.addf %53, %70 : vector<6x240xf32>
    %c0_86 = arith.constant 0 : index
    %c2_87 = arith.constant 2 : index
    %c1_88 = arith.constant 1 : index
    %c0_89 = arith.constant 0 : index
    %72 = vector.load %arg1[%c0_86, %c2_87, %c1_88, %c0_89] : memref<1x4x7x28xf32, #tpu.memory_space<vmem>>, vector<1x1x6x28xf32>
    %73 = vector.shape_cast %72 : vector<1x1x6x28xf32> to vector<6x28xf32>
    %cst_90 = arith.constant dense<0.000000e+00> : vector<6x240xf32>
    %74 = tpu.matmul %73, %59, %cst_90 {dimension_numbers = #tpu.dot_dimension_numbers<[1], [0], [0], [1], [0, 0, 1, 1], [], []>} : vector<6x28xf32>, vector<28x240xf32>, vector<6x240xf32> -> vector<6x240xf32>
    %75 = arith.addf %57, %74 : vector<6x240xf32>
    %c4 = arith.constant 4 : index
    %c0_91 = arith.constant 0 : index
    %c0_92 = arith.constant 0 : index
    %76 = vector.load %arg2[%c4, %c0_91, %c0_92] : memref<5x28x240xf32, #tpu.memory_space<vmem>>, vector<1x28x240xf32>
    %77 = vector.shape_cast %76 : vector<1x28x240xf32> to vector<28x240xf32>
    %c0_93 = arith.constant 0 : index
    %c0_94 = arith.constant 0 : index
    %c1_95 = arith.constant 1 : index
    %c0_96 = arith.constant 0 : index
    %78 = vector.load %arg1[%c0_93, %c0_94, %c1_95, %c0_96] : memref<1x4x7x28xf32, #tpu.memory_space<vmem>>, vector<1x1x6x28xf32>
    %79 = vector.shape_cast %78 : vector<1x1x6x28xf32> to vector<6x28xf32>
    %cst_97 = arith.constant dense<0.000000e+00> : vector<6x240xf32>
    %80 = tpu.matmul %79, %77, %cst_97 {dimension_numbers = #tpu.dot_dimension_numbers<[1], [0], [0], [1], [0, 0, 1, 1], [], []>} : vector<6x28xf32>, vector<28x240xf32>, vector<6x240xf32> -> vector<6x240xf32>
    %81 = arith.addf %63, %80 : vector<6x240xf32>
    %c0_98 = arith.constant 0 : index
    %c1_99 = arith.constant 1 : index
    %c1_100 = arith.constant 1 : index
    %c0_101 = arith.constant 0 : index
    %82 = vector.load %arg1[%c0_98, %c1_99, %c1_100, %c0_101] : memref<1x4x7x28xf32, #tpu.memory_space<vmem>>, vector<1x1x6x28xf32>
    %83 = vector.shape_cast %82 : vector<1x1x6x28xf32> to vector<6x28xf32>
    %cst_102 = arith.constant dense<0.000000e+00> : vector<6x240xf32>
    %84 = tpu.matmul %83, %77, %cst_102 {dimension_numbers = #tpu.dot_dimension_numbers<[1], [0], [0], [1], [0, 0, 1, 1], [], []>} : vector<6x28xf32>, vector<28x240xf32>, vector<6x240xf32> -> vector<6x240xf32>
    %85 = arith.addf %67, %84 : vector<6x240xf32>
    %c0_103 = arith.constant 0 : index
    %c2_104 = arith.constant 2 : index
    %c1_105 = arith.constant 1 : index
    %c0_106 = arith.constant 0 : index
    %86 = vector.load %arg1[%c0_103, %c2_104, %c1_105, %c0_106] : memref<1x4x7x28xf32, #tpu.memory_space<vmem>>, vector<1x1x6x28xf32>
    %87 = vector.shape_cast %86 : vector<1x1x6x28xf32> to vector<6x28xf32>
    %cst_107 = arith.constant dense<0.000000e+00> : vector<6x240xf32>
    %88 = tpu.matmul %87, %77, %cst_107 {dimension_numbers = #tpu.dot_dimension_numbers<[1], [0], [0], [1], [0, 0, 1, 1], [], []>} : vector<6x28xf32>, vector<28x240xf32>, vector<6x240xf32> -> vector<6x240xf32>
    %89 = arith.addf %71, %88 : vector<6x240xf32>
    %c0_108 = arith.constant 0 : index
    %c3_109 = arith.constant 3 : index
    %c1_110 = arith.constant 1 : index
    %c0_111 = arith.constant 0 : index
    %90 = vector.load %arg1[%c0_108, %c3_109, %c1_110, %c0_111] : memref<1x4x7x28xf32, #tpu.memory_space<vmem>>, vector<1x1x6x28xf32>
    %91 = vector.shape_cast %90 : vector<1x1x6x28xf32> to vector<6x28xf32>
    %cst_112 = arith.constant dense<0.000000e+00> : vector<6x240xf32>
    %92 = tpu.matmul %91, %77, %cst_112 {dimension_numbers = #tpu.dot_dimension_numbers<[1], [0], [0], [1], [0, 0, 1, 1], [], []>} : vector<6x28xf32>, vector<28x240xf32>, vector<6x240xf32> -> vector<6x240xf32>
    %93 = arith.addf %75, %92 : vector<6x240xf32>
    %94 = arith.maximumf %81, %85 : vector<6x240xf32>
    %95 = arith.maximumf %89, %93 : vector<6x240xf32>
    %c0_113 = arith.constant 0 : index
    %c0_114 = arith.constant 0 : index
    %96 = vector.load %arg3[%c0_113, %c0_114] : memref<1x120xf32, #tpu.memory_space<vmem>>, vector<1x120xf32>
    %97 = vector.extract_strided_slice %94 {offsets = [0, 0], sizes = [6, 120], strides = [1, 1]} : vector<6x240xf32> to vector<6x120xf32>
    %98 = vector.extract_strided_slice %94 {offsets = [0, 120], sizes = [6, 120], strides = [1, 1]} : vector<6x240xf32> to vector<6x120xf32>
    %99 = arith.maximumf %97, %98 : vector<6x120xf32>
    %100 = vector.broadcast %96 : vector<1x120xf32> to vector<6x120xf32>
    %101 = arith.addf %99, %100 : vector<6x120xf32>
    %cst_115 = arith.constant 0.000000e+00 : f32
    %102 = vector.broadcast %cst_115 : f32 to vector<6x120xf32>
    %103 = arith.maximumf %101, %102 : vector<6x120xf32>
    %104 = vector.extract_strided_slice %95 {offsets = [0, 0], sizes = [6, 120], strides = [1, 1]} : vector<6x240xf32> to vector<6x120xf32>
    %105 = vector.extract_strided_slice %95 {offsets = [0, 120], sizes = [6, 120], strides = [1, 1]} : vector<6x240xf32> to vector<6x120xf32>
    %106 = arith.maximumf %104, %105 : vector<6x120xf32>
    %107 = vector.broadcast %96 : vector<1x120xf32> to vector<6x120xf32>
    %108 = arith.addf %106, %107 : vector<6x120xf32>
    %cst_116 = arith.constant 0.000000e+00 : f32
    %109 = vector.broadcast %cst_116 : f32 to vector<6x120xf32>
    %110 = arith.maximumf %108, %109 : vector<6x120xf32>
    %cst_117 = arith.constant 0.000000e+00 : f32
    %111 = vector.broadcast %cst_117 : f32 to vector<4x160xf32>
    %cst_118 = arith.constant 0.000000e+00 : f32
    %112 = vector.broadcast %cst_118 : f32 to vector<4x160xf32>
    %c0_119 = arith.constant 0 : index
    %c0_120 = arith.constant 0 : index
    %c0_121 = arith.constant 0 : index
    %113 = vector.load %arg4[%c0_119, %c0_120, %c0_121] : memref<5x120x160xf32, #tpu.memory_space<vmem>>, vector<1x120x160xf32>
    %114 = vector.shape_cast %113 : vector<1x120x160xf32> to vector<120x160xf32>
    %115 = vector.extract_strided_slice %103 {offsets = [0, 0], sizes = [4, 120], strides = [1, 1]} : vector<6x120xf32> to vector<4x120xf32>
    %116 = vector.extract_strided_slice %110 {offsets = [0, 0], sizes = [4, 120], strides = [1, 1]} : vector<6x120xf32> to vector<4x120xf32>
    %cst_122 = arith.constant dense<0.000000e+00> : vector<4x160xf32>
    %117 = tpu.matmul %115, %114, %cst_122 {dimension_numbers = #tpu.dot_dimension_numbers<[1], [0], [0], [1], [0, 0, 1, 1], [], []>} : vector<4x120xf32>, vector<120x160xf32>, vector<4x160xf32> -> vector<4x160xf32>
    %118 = arith.addf %111, %117 : vector<4x160xf32>
    %cst_123 = arith.constant dense<0.000000e+00> : vector<4x160xf32>
    %119 = tpu.matmul %116, %114, %cst_123 {dimension_numbers = #tpu.dot_dimension_numbers<[1], [0], [0], [1], [0, 0, 1, 1], [], []>} : vector<4x120xf32>, vector<120x160xf32>, vector<4x160xf32> -> vector<4x160xf32>
    %120 = arith.addf %112, %119 : vector<4x160xf32>
    %c1_124 = arith.constant 1 : index
    %c0_125 = arith.constant 0 : index
    %c0_126 = arith.constant 0 : index
    %121 = vector.load %arg4[%c1_124, %c0_125, %c0_126] : memref<5x120x160xf32, #tpu.memory_space<vmem>>, vector<1x120x160xf32>
    %122 = vector.shape_cast %121 : vector<1x120x160xf32> to vector<120x160xf32>
    %123 = vector.extract_strided_slice %110 {offsets = [0, 0], sizes = [4, 120], strides = [1, 1]} : vector<6x120xf32> to vector<4x120xf32>
    %124 = vector.extract_strided_slice %103 {offsets = [1, 0], sizes = [4, 120], strides = [1, 1]} : vector<6x120xf32> to vector<4x120xf32>
    %cst_127 = arith.constant dense<0.000000e+00> : vector<4x160xf32>
    %125 = tpu.matmul %123, %122, %cst_127 {dimension_numbers = #tpu.dot_dimension_numbers<[1], [0], [0], [1], [0, 0, 1, 1], [], []>} : vector<4x120xf32>, vector<120x160xf32>, vector<4x160xf32> -> vector<4x160xf32>
    %126 = arith.addf %118, %125 : vector<4x160xf32>
    %cst_128 = arith.constant dense<0.000000e+00> : vector<4x160xf32>
    %127 = tpu.matmul %124, %122, %cst_128 {dimension_numbers = #tpu.dot_dimension_numbers<[1], [0], [0], [1], [0, 0, 1, 1], [], []>} : vector<4x120xf32>, vector<120x160xf32>, vector<4x160xf32> -> vector<4x160xf32>
    %128 = arith.addf %120, %127 : vector<4x160xf32>
    %c2_129 = arith.constant 2 : index
    %c0_130 = arith.constant 0 : index
    %c0_131 = arith.constant 0 : index
    %129 = vector.load %arg4[%c2_129, %c0_130, %c0_131] : memref<5x120x160xf32, #tpu.memory_space<vmem>>, vector<1x120x160xf32>
    %130 = vector.shape_cast %129 : vector<1x120x160xf32> to vector<120x160xf32>
    %131 = vector.extract_strided_slice %103 {offsets = [1, 0], sizes = [4, 120], strides = [1, 1]} : vector<6x120xf32> to vector<4x120xf32>
    %132 = vector.extract_strided_slice %110 {offsets = [1, 0], sizes = [4, 120], strides = [1, 1]} : vector<6x120xf32> to vector<4x120xf32>
    %cst_132 = arith.constant dense<0.000000e+00> : vector<4x160xf32>
    %133 = tpu.matmul %131, %130, %cst_132 {dimension_numbers = #tpu.dot_dimension_numbers<[1], [0], [0], [1], [0, 0, 1, 1], [], []>} : vector<4x120xf32>, vector<120x160xf32>, vector<4x160xf32> -> vector<4x160xf32>
    %134 = arith.addf %126, %133 : vector<4x160xf32>
    %cst_133 = arith.constant dense<0.000000e+00> : vector<4x160xf32>
    %135 = tpu.matmul %132, %130, %cst_133 {dimension_numbers = #tpu.dot_dimension_numbers<[1], [0], [0], [1], [0, 0, 1, 1], [], []>} : vector<4x120xf32>, vector<120x160xf32>, vector<4x160xf32> -> vector<4x160xf32>
    %136 = arith.addf %128, %135 : vector<4x160xf32>
    %c3_134 = arith.constant 3 : index
    %c0_135 = arith.constant 0 : index
    %c0_136 = arith.constant 0 : index
    %137 = vector.load %arg4[%c3_134, %c0_135, %c0_136] : memref<5x120x160xf32, #tpu.memory_space<vmem>>, vector<1x120x160xf32>
    %138 = vector.shape_cast %137 : vector<1x120x160xf32> to vector<120x160xf32>
    %139 = vector.extract_strided_slice %110 {offsets = [1, 0], sizes = [4, 120], strides = [1, 1]} : vector<6x120xf32> to vector<4x120xf32>
    %140 = vector.extract_strided_slice %103 {offsets = [2, 0], sizes = [4, 120], strides = [1, 1]} : vector<6x120xf32> to vector<4x120xf32>
    %cst_137 = arith.constant dense<0.000000e+00> : vector<4x160xf32>
    %141 = tpu.matmul %139, %138, %cst_137 {dimension_numbers = #tpu.dot_dimension_numbers<[1], [0], [0], [1], [0, 0, 1, 1], [], []>} : vector<4x120xf32>, vector<120x160xf32>, vector<4x160xf32> -> vector<4x160xf32>
    %142 = arith.addf %134, %141 : vector<4x160xf32>
    %cst_138 = arith.constant dense<0.000000e+00> : vector<4x160xf32>
    %143 = tpu.matmul %140, %138, %cst_138 {dimension_numbers = #tpu.dot_dimension_numbers<[1], [0], [0], [1], [0, 0, 1, 1], [], []>} : vector<4x120xf32>, vector<120x160xf32>, vector<4x160xf32> -> vector<4x160xf32>
    %144 = arith.addf %136, %143 : vector<4x160xf32>
    %c4_139 = arith.constant 4 : index
    %c0_140 = arith.constant 0 : index
    %c0_141 = arith.constant 0 : index
    %145 = vector.load %arg4[%c4_139, %c0_140, %c0_141] : memref<5x120x160xf32, #tpu.memory_space<vmem>>, vector<1x120x160xf32>
    %146 = vector.shape_cast %145 : vector<1x120x160xf32> to vector<120x160xf32>
    %147 = vector.extract_strided_slice %103 {offsets = [2, 0], sizes = [4, 120], strides = [1, 1]} : vector<6x120xf32> to vector<4x120xf32>
    %148 = vector.extract_strided_slice %110 {offsets = [2, 0], sizes = [4, 120], strides = [1, 1]} : vector<6x120xf32> to vector<4x120xf32>
    %cst_142 = arith.constant dense<0.000000e+00> : vector<4x160xf32>
    %149 = tpu.matmul %147, %146, %cst_142 {dimension_numbers = #tpu.dot_dimension_numbers<[1], [0], [0], [1], [0, 0, 1, 1], [], []>} : vector<4x120xf32>, vector<120x160xf32>, vector<4x160xf32> -> vector<4x160xf32>
    %150 = arith.addf %142, %149 : vector<4x160xf32>
    %cst_143 = arith.constant dense<0.000000e+00> : vector<4x160xf32>
    %151 = tpu.matmul %148, %146, %cst_143 {dimension_numbers = #tpu.dot_dimension_numbers<[1], [0], [0], [1], [0, 0, 1, 1], [], []>} : vector<4x120xf32>, vector<120x160xf32>, vector<4x160xf32> -> vector<4x160xf32>
    %152 = arith.addf %144, %151 : vector<4x160xf32>
    %153 = arith.maximumf %150, %152 : vector<4x160xf32>
    %154 = vector.extract_strided_slice %153 {offsets = [0, 0], sizes = [4, 80], strides = [1, 1]} : vector<4x160xf32> to vector<4x80xf32>
    %155 = vector.extract_strided_slice %153 {offsets = [0, 80], sizes = [4, 80], strides = [1, 1]} : vector<4x160xf32> to vector<4x80xf32>
    %156 = arith.maximumf %154, %155 : vector<4x80xf32>
    %c0_144 = arith.constant 0 : index
    %c0_145 = arith.constant 0 : index
    %157 = vector.load %arg5[%c0_144, %c0_145] : memref<1x80xf32, #tpu.memory_space<vmem>>, vector<1x80xf32>
    %158 = vector.broadcast %157 : vector<1x80xf32> to vector<4x80xf32>
    %159 = arith.addf %156, %158 : vector<4x80xf32>
    %cst_146 = arith.constant 0.000000e+00 : f32
    %160 = vector.broadcast %cst_146 : f32 to vector<4x80xf32>
    %161 = arith.maximumf %159, %160 : vector<4x80xf32>
    %c0_147 = arith.constant 0 : index
    %c0_148 = arith.constant 0 : index
    %162 = vector.load %arg7[%c0_147, %c0_148] : memref<1x50xf32, #tpu.memory_space<vmem>>, vector<1x50xf32>
    %163 = vector.extract_strided_slice %161 {offsets = [0, 0], sizes = [1, 80], strides = [1, 1]} : vector<4x80xf32> to vector<1x80xf32>
    %c0_149 = arith.constant 0 : index
    %c0_150 = arith.constant 0 : index
    %c0_151 = arith.constant 0 : index
    %164 = vector.load %arg6[%c0_149, %c0_150, %c0_151] : memref<4x80x50xf32, #tpu.memory_space<vmem>>, vector<1x80x50xf32>
    %165 = vector.shape_cast %164 : vector<1x80x50xf32> to vector<80x50xf32>
    %cst_152 = arith.constant dense<0.000000e+00> : vector<1x50xf32>
    %166 = tpu.matmul %163, %165, %cst_152 {dimension_numbers = #tpu.dot_dimension_numbers<[1], [0], [0], [1], [0, 0, 1, 1], [], []>} : vector<1x80xf32>, vector<80x50xf32>, vector<1x50xf32> -> vector<1x50xf32>
    %167 = arith.addf %162, %166 : vector<1x50xf32>
    %168 = vector.extract_strided_slice %161 {offsets = [1, 0], sizes = [1, 80], strides = [1, 1]} : vector<4x80xf32> to vector<1x80xf32>
    %c1_153 = arith.constant 1 : index
    %c0_154 = arith.constant 0 : index
    %c0_155 = arith.constant 0 : index
    %169 = vector.load %arg6[%c1_153, %c0_154, %c0_155] : memref<4x80x50xf32, #tpu.memory_space<vmem>>, vector<1x80x50xf32>
    %170 = vector.shape_cast %169 : vector<1x80x50xf32> to vector<80x50xf32>
    %cst_156 = arith.constant dense<0.000000e+00> : vector<1x50xf32>
    %171 = tpu.matmul %168, %170, %cst_156 {dimension_numbers = #tpu.dot_dimension_numbers<[1], [0], [0], [1], [0, 0, 1, 1], [], []>} : vector<1x80xf32>, vector<80x50xf32>, vector<1x50xf32> -> vector<1x50xf32>
    %172 = arith.addf %167, %171 : vector<1x50xf32>
    %173 = vector.extract_strided_slice %161 {offsets = [2, 0], sizes = [1, 80], strides = [1, 1]} : vector<4x80xf32> to vector<1x80xf32>
    %c2_157 = arith.constant 2 : index
    %c0_158 = arith.constant 0 : index
    %c0_159 = arith.constant 0 : index
    %174 = vector.load %arg6[%c2_157, %c0_158, %c0_159] : memref<4x80x50xf32, #tpu.memory_space<vmem>>, vector<1x80x50xf32>
    %175 = vector.shape_cast %174 : vector<1x80x50xf32> to vector<80x50xf32>
    %cst_160 = arith.constant dense<0.000000e+00> : vector<1x50xf32>
    %176 = tpu.matmul %173, %175, %cst_160 {dimension_numbers = #tpu.dot_dimension_numbers<[1], [0], [0], [1], [0, 0, 1, 1], [], []>} : vector<1x80xf32>, vector<80x50xf32>, vector<1x50xf32> -> vector<1x50xf32>
    %177 = arith.addf %172, %176 : vector<1x50xf32>
    %178 = vector.extract_strided_slice %161 {offsets = [3, 0], sizes = [1, 80], strides = [1, 1]} : vector<4x80xf32> to vector<1x80xf32>
    %c3_161 = arith.constant 3 : index
    %c0_162 = arith.constant 0 : index
    %c0_163 = arith.constant 0 : index
    %179 = vector.load %arg6[%c3_161, %c0_162, %c0_163] : memref<4x80x50xf32, #tpu.memory_space<vmem>>, vector<1x80x50xf32>
    %180 = vector.shape_cast %179 : vector<1x80x50xf32> to vector<80x50xf32>
    %cst_164 = arith.constant dense<0.000000e+00> : vector<1x50xf32>
    %181 = tpu.matmul %178, %180, %cst_164 {dimension_numbers = #tpu.dot_dimension_numbers<[1], [0], [0], [1], [0, 0, 1, 1], [], []>} : vector<1x80xf32>, vector<80x50xf32>, vector<1x50xf32> -> vector<1x50xf32>
    %182 = arith.addf %177, %181 : vector<1x50xf32>
    %cst_165 = arith.constant 0.000000e+00 : f32
    %183 = vector.broadcast %cst_165 : f32 to vector<1x50xf32>
    %184 = arith.maximumf %182, %183 : vector<1x50xf32>
    %c0_166 = arith.constant 0 : index
    %c0_167 = arith.constant 0 : index
    %185 = vector.load %arg8[%c0_166, %c0_167] : memref<50x128xf32, #tpu.memory_space<vmem>>, vector<50x128xf32>
    %cst_168 = arith.constant dense<0.000000e+00> : vector<1x128xf32>
    %186 = tpu.matmul %184, %185, %cst_168 {dimension_numbers = #tpu.dot_dimension_numbers<[1], [0], [0], [1], [0, 0, 1, 1], [], []>} : vector<1x50xf32>, vector<50x128xf32>, vector<1x128xf32> -> vector<1x128xf32>
    %c0_169 = arith.constant 0 : index
    %c0_170 = arith.constant 0 : index
    %187 = vector.load %arg9[%c0_169, %c0_170] : memref<1x128xf32, #tpu.memory_space<vmem>>, vector<1x128xf32>
    %188 = arith.addf %186, %187 : vector<1x128xf32>
    %189 = vector.shape_cast %188 : vector<1x128xf32> to vector<1x1x128xf32>
    %c0_171 = arith.constant 0 : index
    %c0_172 = arith.constant 0 : index
    %c0_173 = arith.constant 0 : index
    %190 = vector.load %arg10[%c0_171, %c0_172, %c0_173] : memref<1x1x128xf32, #tpu.memory_space<vmem>>, vector<1x1x128xf32>
    tpu.vector_store %arg10[%c0_171, %c0_172, %c0_173], %189 {strides = array<i32>} : memref<1x1x128xf32, #tpu.memory_space<vmem>>, vector<1x1x128xf32>,
    return
  }
  func.func @transform_0(%arg0: i32) -> (i32, i32, i32, i32) {
    %c0_i32 = arith.constant 0 : i32
    %c0_i32_0 = arith.constant 0 : i32
    %c0_i32_1 = arith.constant 0 : i32
    %c0_i32_2 = arith.constant 0 : i32
    return %arg0, %c0_i32, %c0_i32_0, %c0_i32_1 : i32, i32, i32, i32
  }
  func.func @transform_1(%arg0: i32) -> (i32, i32, i32) {
    %c0_i32 = arith.constant 0 : i32
    %c0_i32_0 = arith.constant 0 : i32
    %c0_i32_1 = arith.constant 0 : i32
    %c0_i32_2 = arith.constant 0 : i32
    return %c0_i32, %c0_i32_0, %c0_i32_1 : i32, i32, i32
  }
  func.func @transform_2(%arg0: i32) -> (i32, i32) {
    %c0_i32 = arith.constant 0 : i32
    %c0_i32_0 = arith.constant 0 : i32
    %c0_i32_1 = arith.constant 0 : i32
    return %c0_i32, %c0_i32_0 : i32, i32
  }
  func.func @transform_3(%arg0: i32) -> (i32, i32, i32) {
    %c0_i32 = arith.constant 0 : i32
    %c0_i32_0 = arith.constant 0 : i32
    %c0_i32_1 = arith.constant 0 : i32
    %c0_i32_2 = arith.constant 0 : i32
    return %c0_i32, %c0_i32_0, %c0_i32_1 : i32, i32, i32
  }
  func.func @transform_4(%arg0: i32) -> (i32, i32) {
    %c0_i32 = arith.constant 0 : i32
    %c0_i32_0 = arith.constant 0 : i32
    %c0_i32_1 = arith.constant 0 : i32
    return %c0_i32, %c0_i32_0 : i32, i32
  }
  func.func @transform_5(%arg0: i32) -> (i32, i32, i32) {
    %c0_i32 = arith.constant 0 : i32
    %c0_i32_0 = arith.constant 0 : i32
    %c0_i32_1 = arith.constant 0 : i32
    %c0_i32_2 = arith.constant 0 : i32
    return %c0_i32, %c0_i32_0, %c0_i32_1 : i32, i32, i32
  }
  func.func @transform_6(%arg0: i32) -> (i32, i32) {
    %c0_i32 = arith.constant 0 : i32
    %c0_i32_0 = arith.constant 0 : i32
    %c0_i32_1 = arith.constant 0 : i32
    return %c0_i32, %c0_i32_0 : i32, i32
  }
  func.func @transform_7(%arg0: i32) -> (i32, i32) {
    %c0_i32 = arith.constant 0 : i32
    %c0_i32_0 = arith.constant 0 : i32
    %c0_i32_1 = arith.constant 0 : i32
    return %c0_i32, %c0_i32_0 : i32, i32
  }
  func.func @transform_8(%arg0: i32) -> (i32, i32) {
    %c0_i32 = arith.constant 0 : i32
    %c0_i32_0 = arith.constant 0 : i32
    %c0_i32_1 = arith.constant 0 : i32
    return %c0_i32, %c0_i32_0 : i32, i32
  }
  func.func @transform_9(%arg0: i32) -> (i32, i32, i32) {
    %c0_i32 = arith.constant 0 : i32
    %c0_i32_0 = arith.constant 0 : i32
    %c0_i32_1 = arith.constant 0 : i32
    return %arg0, %c0_i32, %c0_i32_0 : i32, i32, i32
  }
}

</mosaic_0001>

<bundles_post_ra>
// kernel: cnn_forward.1
= control target key start
LH: loop header
LB: loop body
LE: loop exit
PB: predicated region body
PF: predicated region fallthrough
CT: control target
= control target key end

     0   :  { %14 = vsyncpa [#allocation3], 0  ;;  %s4002_s0 = inlined_call_operand.vmem [shape: f32[2,4,7,28], index: 0, kind: input, shape index: {}]   ;;  %s4003_s1 = inlined_call_operand.vmem [shape: f32[5,28,240], index: 1, kind: input, shape index: {}]   ;;  %s4004_s2 = inlined_call_operand.vmem [shape: f32[1,120], index: 2, kind: input, shape index: {}]   ;;  %s4005_s3 = inlined_call_operand.vmem [shape: f32[5,120,160], index: 3, kind: input, shape index: {}]   ;;  %s4006_s4 = inlined_call_operand.vmem [shape: f32[1,80], index: 4, kind: input, shape index: {}]   ;;  %s4007_s5 = inlined_call_operand.vmem [shape: f32[4,80,50], index: 5, kind: input, shape index: {}]   ;;  %s4008_s6 = inlined_call_operand.vmem [shape: f32[1,50], index: 6, kind: input, shape index: {}]   ;;  %s4009_s7 = inlined_call_operand.vmem [shape: f32[50,128], index: 7, kind: input, shape index: {}]   ;;  %s4010_s8 = inlined_call_operand.vmem [shape: f32[1,128], index: 8, kind: input, shape index: {}]   ;;  %s4011_s9 = inlined_call_operand.hbm [shape: f32[2,1,128], index: 9, kind: output, shape index: {}]  }
   0x1   :  { %16 = vsyncpa [#allocation3 + $0x1], 0  ;;  %s2608_s30 = smov 0   ;;  %s2610_s10 = smov 0  }
   0x2   :  { %s2612_s11 = smov 0   ;;  %s2614_s12 = smov 0  }
   0x3 LB: > { %s2629_s13 = sadd.s32 4294967295, %s2554_s12   ;;  %s2146_s14 = sadd.s32 4294967294, %s2554_s12   ;;  %s2554_s12 = sphi %s2614_s12, %s4017_s12   ;;  %s2550_s11 = sphi %s2612_s11, %s4016_s11   ;;  %s2546_s10 = sphi %s2610_s10, %s4015_s10   ;;  %s2542_s30 = sphi %s2608_s30, %s4014_s30  }
   0x4   : > { %s2633_s15 = sadd.s32 1, %s2554_s12   ;;  %s223_s16 = sadd.s32 1, %s2550_s11 }
   0x5   : > { %s220_s17 = ssub.s32 %s2554_s12, %s2633_s15  ;;  %p233_p0 = scmp.ne.s32.totalorder %s2550_s11, %s2546_s10 }
   0x6   : > { %p221_p1 = scmp.eq.s32.totalorder %s220_s17, 0  ;;  %p234_p2 = scmp.eq.s32.totalorder %s2629_s13, 1 }
   0x7   : > { %p239_p3 = scmp.ne.s32.totalorder %s2546_s10, %s2542_s30  ;;  %p240_p4 = scmp.eq.s32.totalorder %s2146_s14, 1 }
   0x8   : > { %s2644_s18 = scalar_select %p221_p1, %s2550_s11, %s223_s16  }
   0x9   : > { %p2646_p5 = por %p234_p2, %p233_p0  ;;  %p2650_p6 = por %p240_p4, %p239_p3 }
   0xa   : > { %p2149_p7 = scmp.ge.s32.totalorder %s2554_s12, 1  ;;  %p290_p8 = scmp.lt.s32.totalorder %s2554_s12, 3 }
   0xc   : > { %p291_p9 = pnand %p2149_p7, %p290_p8 }
   0xd   : > { %p325_p10 = scmp.lt.s32.totalorder (!%p291_p9), %s2629_s13, 1  ;;  %s2556_s24 = smov (!%p291_p9), 8  }
   0xe   : > { %294 = sbr.rel (%p291_p9) target bundleno = 987 (0x3db), region = 56  ;;  %s2557_s16 = smov (!%p291_p9), 48  }
   0xf   : > { %s323_s26 = sand.u32 (!%p291_p9), 1, %s2546_s10   ;;  %s2087_s28 = scalar_lea.hbm (!%p291_p9), %s4011_s9, %s2629_s13 }
  0x10   : > { %s2091_s17 = sshll.u32 (!%p291_p9), %s2087_s28, 4  ;;  %s2079_s21 = scalar_lea.sflag (!%p291_p9), [#allocation3], %s323_s26  ;;  %s2092_s17 = int_to_ptr.hbm [resolvable:$true] %s2091_s17 }
  0x13   : > { %v2659_v0 = vld [vmem:[%s4003_s1 + $0x70] sm:$0xf]  ;;  %vm358_vm0 = vcmask 1043456   ;;  %v2669_v2 = vld [vmem:[%s4003_s1 + $0x60] sm:$0xff]  ;;  %v2678_v3 = vld [vmem:[%s4003_s1 + $0x38] sm:$0xf] }
  0x14   : > { %v2664_v1 = vld [vmem:[%s4003_s1 + $0x30] sm:$0xf]  ;;  %2163 = vmatpush.msk.msra.mxu1 %vm358_vm0, %v2659_v0  ;;  %v2683_v4 = vld [vmem:[%s4003_s1 + $0x20] sm:$0xff]  ;;  %v2688_v5 = vld [vmem:[%s4003_s1 + $0x28] sm:$0xff]  ;;  %2169 = vmatpush.msk.msra.mxu3 %vm358_vm0, %v2678_v3  ;;  %s326_s27 = scalar_select %p325_p10, %s2629_s13, 1  ;;  %vm354_vm1 = vcmask 228352  }
  0x15   : > { %2167 = vmatpush.msk.msra.mxu2 %vm358_vm0, %v2664_v1  ;;  %2171 = vmatpush.msk.msra.mxu0 %vm358_vm0, %v2659_v0  ;;  %v2698_v6 = vld [vmem:[%s4003_s1 + $0x50] sm:$0xff]  ;;  %v2710_v8 = vld [vmem:[%s4003_s1 + $0x18] sm:$0xff]  ;;  %v2155_v9 = vld [vmem:[%s4003_s1 + $0x40] sm:$0xff]  ;;  %vm1276_vm2 = vcmask 64512   ;;  %vm1357_vm3 = vcmask 982016   ;;  %vm1889_vm4 = vcmask 392192  }
  0x16   : > { %v2703_v7 = vld [vmem:[%s4003_s1 + $0x10] sm:$0xff]  ;;  %378 = vmatpush.msra.mxu1 %v2669_v2  ;;  %447 = vmatpush.msra.mxu3 %v2688_v5  ;;  %v2721_v10 = vld [vmem:[%s4003_s1] sm:$0xff]  ;;  %v2728_v11 = vld [vmem:[%s4003_s1 + $0x8] sm:$0xff]  ;;  %s2448_s22 = sshll.u32 %s326_s27, 5  ;;  %vm1910_vm5 = vcmask 654336   ;;  %vm2053_vm6 = vcmask 1041408  }
  0x17   : > { %427 = vmatpush.msra.mxu2 %v2683_v4  ;;  %470 = vmatpush.msra.mxu0 %v2669_v2  ;;  %s2735_s25 = scalar_lea.vmem %s4002_s0, %s2448_s22  ;;  %v2747_v15 = vld [vmem:[%s4003_s1 + $0x78] sm:$0xf]  ;;  %v2757_v16 = vld [vmem:[%s4003_s1 + $0x68] sm:$0xff]  ;;  %v2201_v21 = vld [vmem:[%s4003_s1 + $0xb0] sm:$0xf]  ;;  %vm2049_vm7 = vcmask 408576  }
  0x18   : > { %379 = vmatpush.msra.mxu1 %v2698_v6  ;;  %448 = vmatpush.msra.mxu3 %v2710_v8  ;;  %v2152_v12 = vld [vmem:[%s2735_s25 + $0x8] sm:$0x3f]  ;;  %v338_v13 = vld [vmem:[%s2735_s25] sm:$0x3f]  ;;  %v2741_v14 = vld [vmem:[%s2735_s25 + $0x10] sm:$0x3f] }
  0x19   : > { %428 = vmatpush.msra.mxu2 %v2703_v7  ;;  %471 = vmatpush.msra.mxu0 %v2698_v6  ;;  %v2770_v17 = vld [vmem:[%s4003_s1 + $0x58] sm:$0xff]  ;;  %v2779_v18 = vld [vmem:[%s4003_s1 + $0x48] sm:$0xff]  ;;  %v2815_v20 = vld [vmem:[%s2735_s25 + $0x1] sm:$0x3f]  ;;  %s2506_s22 = sshra.s32 %s2092_s17, 4  ;;  %s2512_s27 = scalar_lea.hbm %s4011_s9, 2  ;;  %s2507_s22 = int_to_ptr.hbm [resolvable:$true] %s2506_s22 }
  0x1a   : > { %380 = vmatpush.msra.mxu1 %v2155_v9  ;;  %449 = vmatpush.msra.mxu3 %v2728_v11  ;;  %v2788_v19 = vld [vmem:[%s2735_s25 + $0x18] sm:$0x3f]  ;;  %v2199_v22 = vld [vmem:[%s4003_s1 + $0xa0] sm:$0xff]  ;;  %v2197_v23 = vld [vmem:[%s4003_s1 + $0x90] sm:$0xff]  ;;  %s2508_s23 = scalar_lea.hbm %s2507_s22, 1  ;;  %p2513_p0 = scmp.lt.s32.totalorder %s2507_s22, %s4011_s9 }
  0x1b   : > { %429 = vmatpush.msra.mxu2 %v2721_v10  ;;  %472 = vmatpush.msra.mxu0 %v2155_v9  ;;  %v2195_v24 = vld [vmem:[%s4003_s1 + $0x80] sm:$0xff]  ;;  %v2202_v25 = vld [vmem:[%s4003_s1 + $0xb8] sm:$0xf]  ;;  %v2200_v26 = vld [vmem:[%s4003_s1 + $0xa8] sm:$0xff]  ;;  %p2509_p11 = scmp.ne.s32.totalorder %s2507_s22, %s2508_s23  ;;  %p2514_p1 = scmp.lt.s32.totalorder %s2512_s27, %s2508_s23 }
  0x1c   : > { %2164 = vmatmul.msk.f32.vlgmr.msra.gmra.mxu1 %vm354_vm1, %v2152_v12  ;;  %2168 = vmatmul.msk.f32.vlgmr.msra.gmra.mxu2 %vm354_vm1, %v338_v13  ;;  %v2198_v27 = vld [vmem:[%s4003_s1 + $0x98] sm:$0xff]  ;;  %v2196_v28 = vld [vmem:[%s4003_s1 + $0x88] sm:$0xff]  ;;  %v2226_v29 = vld [vmem:[%s4003_s1 + $0xf0] sm:$0xf] }
  0x1d   : > { %2170 = vmatmul.msk.f32.vlgmr.msra.gmra.mxu3 %vm354_vm1, %v338_v13  ;;  %2172 = vmatmul.msk.f32.vlgmr.msra.gmra.mxu0 %vm354_vm1, %v2741_v14  ;;  %v2224_v30 = vld [vmem:[%s4003_s1 + $0xe0] sm:$0xff]  ;;  %v2222_v31 = vld [vmem:[%s4003_s1 + $0xd0] sm:$0xff]  ;;  %v2907_v33 = vld [vmem:[%s2735_s25 + $0x9] sm:$0x3f]  ;;  %p2510_p12 = pnand %p2509_p11, %p2646_p5  ;;  %p2515_p2 = por %p2514_p1, %p2513_p0 }
  0x1e   : > { %2165 = vmatpush.msk.msrb.mxu1 %vm358_vm0, %v2747_v15  ;;  %2175 = vmatpush.msk.msrb.mxu2 %vm358_vm0, %v2664_v1  ;;  %v2220_v32 = vld [vmem:[%s4003_s1 + $0xc0] sm:$0xff]  ;;  %v2227_v34 = vld [vmem:[%s4003_s1 + $0xf8] sm:$0xf]  ;;  %v2225_v35 = vld [vmem:[%s4003_s1 + $0xe8] sm:$0xff] }
  0x1f   : > { %2177 = vmatpush.msk.msrb.mxu3 %vm358_vm0, %v2678_v3  ;;  %2179 = vmatpush.msk.msrb.mxu0 %vm358_vm0, %v2659_v0  ;;  %v2223_v36 = vld [vmem:[%s4003_s1 + $0xd8] sm:$0xff]  ;;  %v2221_v37 = vld [vmem:[%s4003_s1 + $0xc8] sm:$0xff]  ;;  %v2251_v38 = vld [vmem:[%s4003_s1 + $0x130] sm:$0xf]  ;;  %p2511_p13 = pneg %p2510_p12 }
  0x20   : > { %398 = vmatpush.msrb.mxu1 %v2757_v16  ;;  %510 = vmatpush.msrb.mxu2 %v2683_v4  ;;  %v2249_v39 = vld [vmem:[%s4003_s1 + $0x120] sm:$0xff]  ;;  %v2247_v40 = vld [vmem:[%s4003_s1 + $0x110] sm:$0xff]  ;;  %v2252_v43 = vld [vmem:[%s4003_s1 + $0x138] sm:$0xf] }
  0x21   : > { %530 = vmatpush.msrb.mxu3 %v2688_v5  ;;  %553 = vmatpush.msrb.mxu0 %v2669_v2  ;;  %v2245_v41 = vld [vmem:[%s4003_s1 + $0x100] sm:$0xff]  ;;  %v2240_v42 = vld [vmem:[%s2735_s25 + $0x11] sm:$0x3f]  ;;  %v2250_v44 = vld [vmem:[%s4003_s1 + $0x128] sm:$0xff]  ;;  %p2516_p3 = pnand %p2515_p2, %p2511_p13 }
  0x22   : > { %399 = vmatpush.msrb.mxu1 %v2770_v17  ;;  %511 = vmatpush.msrb.mxu2 %v2703_v7  ;;  %v2248_v45 = vld [vmem:[%s4003_s1 + $0x118] sm:$0xff]  ;;  %v2246_v46 = vld [vmem:[%s4003_s1 + $0x108] sm:$0xff] }
  0x23   : > { %531 = vmatpush.msrb.mxu3 %v2710_v8  ;;  %554 = vmatpush.msrb.mxu0 %v2698_v6  ;;  %v2265_v47 = vld [vmem:[%s2735_s25 + $0x19] sm:$0x3f] }
  0x24   : > { %400 = vmatpush.msrb.mxu1 %v2779_v18  ;;  %512 = vmatpush.msrb.mxu2 %v2721_v10 }
  0x25   : > { %532 = vmatpush.msrb.mxu3 %v2728_v11  ;;  %555 = vmatpush.msrb.mxu0 %v2155_v9 }
  0x26   : > { %2166 = vmatmul.msk.f32.vlgmr.msrb.gmra.mxu1 %vm354_vm1, %v2152_v12  ;;  %2176 = vmatmul.msk.f32.vlgmr.msrb.gmra.mxu2 %vm354_vm1, %v2152_v12 }
  0x27   : > { %2178 = vmatmul.msk.f32.vlgmr.msrb.gmra.mxu3 %vm354_vm1, %v2152_v12  ;;  %2180 = vmatmul.msk.f32.vlgmr.msrb.gmra.mxu0 %vm354_vm1, %v2788_v19 }
  0x28   : > { %2173 = vmatpush.msk.msra.mxu1 %vm358_vm0, %v2747_v15  ;;  %2183 = vmatpush.msk.msra.mxu2 %vm358_vm0, %v2664_v1 }
  0x29   : > { %2185 = vmatpush.msk.msra.mxu3 %vm358_vm0, %v2678_v3  ;;  %2187 = vmatpush.msk.msra.mxu0 %vm358_vm0, %v2659_v0 }
  0x2a   : > { %490 = vmatpush.msra.mxu1 %v2757_v16  ;;  %593 = vmatpush.msra.mxu2 %v2683_v4 }
  0x2b   : > { %613 = vmatpush.msra.mxu3 %v2688_v5  ;;  %637 = vmatpush.msra.mxu0 %v2669_v2 }
  0x2c   : > { %491 = vmatpush.msra.mxu1 %v2770_v17  ;;  %594 = vmatpush.msra.mxu2 %v2703_v7 }
  0x2d   : > { %614 = vmatpush.msra.mxu3 %v2710_v8  ;;  %638 = vmatpush.msra.mxu0 %v2698_v6 }
  0x2e   : > { %492 = vmatpush.msra.mxu1 %v2779_v18  ;;  %595 = vmatpush.msra.mxu2 %v2721_v10 }
  0x2f   : > { %615 = vmatpush.msra.mxu3 %v2728_v11  ;;  %639 = vmatpush.msra.mxu0 %v2155_v9 }
  0x30   : > { %2174 = vmatmul.msk.f32.vlgmr.msra.gmra.mxu1 %vm354_vm1, %v2741_v14  ;;  %2184 = vmatmul.msk.f32.vlgmr.msra.gmra.mxu2 %vm354_vm1, %v2741_v14 }
  0x31   : > { %2186 = vmatmul.msk.f32.vlgmr.msra.gmra.mxu3 %vm354_vm1, %v2741_v14  ;;  %2188 = vmatmul.msk.f32.vlgmr.msra.gmra.mxu0 %vm354_vm1, %v2815_v20 }
  0x32   : > { %2181 = vmatpush.msk.msrb.mxu1 %vm358_vm0, %v2747_v15  ;;  %2191 = vmatpush.msk.msrb.mxu2 %vm358_vm0, %v2664_v1 }
  0x33   : > { %2193 = vmatpush.msk.msrb.mxu3 %vm358_vm0, %v2678_v3  ;;  %2203 = vmatpush.msk.msrb.mxu0 %vm358_vm0, %v2201_v21 }
  0x34   : > { %573 = vmatpush.msrb.mxu1 %v2757_v16  ;;  %677 = vmatpush.msrb.mxu2 %v2683_v4 }
  0x35   : > { %697 = vmatpush.msrb.mxu3 %v2688_v5  ;;  %732 = vmatpush.msrb.mxu0 %v2199_v22 }
  0x36   : > { %574 = vmatpush.msrb.mxu1 %v2770_v17  ;;  %678 = vmatpush.msrb.mxu2 %v2703_v7 }
  0x37   : > { %698 = vmatpush.msrb.mxu3 %v2710_v8  ;;  %733 = vmatpush.msrb.mxu0 %v2197_v23 }
  0x38   : > { %575 = vmatpush.msrb.mxu1 %v2779_v18  ;;  %679 = vmatpush.msrb.mxu2 %v2721_v10 }
  0x39   : > { %699 = vmatpush.msrb.mxu3 %v2728_v11  ;;  %734 = vmatpush.msrb.mxu0 %v2195_v24 }
  0x3a   : > { %2182 = vmatmul.msk.f32.vlgmr.msrb.gmra.mxu1 %vm354_vm1, %v2788_v19  ;;  %2192 = vmatmul.msk.f32.vlgmr.msrb.gmra.mxu2 %vm354_vm1, %v2788_v19 }
  0x3b   : > { %2194 = vmatmul.msk.f32.vlgmr.msrb.gmra.mxu3 %vm354_vm1, %v2788_v19  ;;  %2204 = vmatmul.msk.f32.vlgmr.msrb.gmra.mxu0 %vm354_vm1, %v2741_v14 }
  0x3c   : > { %2189 = vmatpush.msk.msra.mxu1 %vm358_vm0, %v2747_v15  ;;  %2207 = vmatpush.msk.msra.mxu2 %vm358_vm0, %v2201_v21  ;;  %v3049_v15 = vld [vmem:[%s4005_s3 + $0xe8] sm:$0xff] }
  0x3d   : > { %2209 = vmatpush.msk.msra.mxu3 %vm358_vm0, %v2202_v25  ;;  %2211 = vmatpush.msk.msra.mxu0 %vm358_vm0, %v2201_v21 }
  0x3e   : > { %657 = vmatpush.msra.mxu1 %v2757_v16  ;;  %774 = vmatpush.msra.mxu2 %v2199_v22  ;;  %v3054_v16 = vld [vmem:[%s4005_s3 + $0xd0] sm:$0xff] }
  0x3f   : > { %794 = vmatpush.msra.mxu3 %v2200_v26  ;;  %816 = vmatpush.msra.mxu0 %v2199_v22 }
  0x40   : > { %658 = vmatpush.msra.mxu1 %v2770_v17  ;;  %775 = vmatpush.msra.mxu2 %v2197_v23  ;;  %v3061_v17 = vld [vmem:[%s4005_s3 + $0xd8] sm:$0xff] }
  0x41   : > { %795 = vmatpush.msra.mxu3 %v2198_v27  ;;  %817 = vmatpush.msra.mxu0 %v2197_v23 }
  0x42   : > { %659 = vmatpush.msra.mxu1 %v2779_v18  ;;  %776 = vmatpush.msra.mxu2 %v2195_v24  ;;  %v3066_v18 = vld [vmem:[%s4005_s3 + $0xc0] sm:$0xff] }
  0x43   : > { %796 = vmatpush.msra.mxu3 %v2196_v28  ;;  %818 = vmatpush.msra.mxu0 %v2195_v24 }
  0x44   : > { %2190 = vmatmul.msk.f32.vlgmr.msra.gmra.mxu1 %vm354_vm1, %v2815_v20  ;;  %2208 = vmatmul.msk.f32.vlgmr.msra.gmra.mxu2 %vm354_vm1, %v2788_v19 }
  0x45   : > { %2210 = vmatmul.msk.f32.vlgmr.msra.gmra.mxu3 %vm354_vm1, %v2788_v19  ;;  %2212 = vmatmul.msk.f32.vlgmr.msra.gmra.mxu0 %vm354_vm1, %v2815_v20 }
  0x46   : > { %2205 = vmatpush.msk.msrb.mxu1 %vm358_vm0, %v2202_v25  ;;  %2216 = vmatpush.msk.msrb.mxu2 %vm358_vm0, %v2201_v21 }
  0x47   : > { %2218 = vmatpush.msk.msrb.mxu3 %vm358_vm0, %v2202_v25  ;;  %2228 = vmatpush.msk.msrb.mxu0 %vm358_vm0, %v2226_v29 }
  0x48   : > { %752 = vmatpush.msrb.mxu1 %v2200_v26  ;;  %862 = vmatpush.msrb.mxu2 %v2199_v22  ;;  %v3085_v22 = vld [vmem:[%s4005_s3 + $0xb0] sm:$0xff] }
  0x49   : > { %882 = vmatpush.msrb.mxu3 %v2200_v26  ;;  %919 = vmatpush.msrb.mxu0 %v2224_v30 }
  0x4a   : > { %753 = vmatpush.msrb.mxu1 %v2198_v27  ;;  %863 = vmatpush.msrb.mxu2 %v2197_v23  ;;  %v3090_v23 = vld [vmem:[%s4005_s3 + $0x1d8] sm:$0xff] }
  0x4b   : > { %883 = vmatpush.msrb.mxu3 %v2198_v27  ;;  %920 = vmatpush.msrb.mxu0 %v2222_v31 }
  0x4c   : > { %754 = vmatpush.msrb.mxu1 %v2196_v28  ;;  %864 = vmatpush.msrb.mxu2 %v2195_v24 }
  0x4d   : > { %884 = vmatpush.msrb.mxu3 %v2196_v28  ;;  %921 = vmatpush.msrb.mxu0 %v2220_v32 }
  0x4e   : > { %2206 = vmatmul.msk.f32.vlgmr.msrb.gmra.mxu1 %vm354_vm1, %v2741_v14  ;;  %2217 = vmatmul.msk.f32.vlgmr.msrb.gmra.mxu2 %vm354_vm1, %v2907_v33  ;;  %v3044_v14 = vld [vmem:[%s4005_s3 + $0xe0] sm:$0xff] }
  0x4f   : > { %2219 = vmatmul.msk.f32.vlgmr.msrb.gmra.mxu3 %vm354_vm1, %v2907_v33  ;;  %2229 = vmatmul.msk.f32.vlgmr.msrb.gmra.mxu0 %vm354_vm1, %v2788_v19 }
  0x50   : > { %2213 = vmatpush.msk.msra.mxu1 %vm358_vm0, %v2202_v25  ;;  %2232 = vmatpush.msk.msra.mxu2 %vm358_vm0, %v2226_v29 }
  0x51   : > { %2234 = vmatpush.msk.msra.mxu3 %vm358_vm0, %v2227_v34  ;;  %2236 = vmatpush.msk.msra.mxu0 %vm358_vm0, %v2226_v29 }
  0x52   : > { %836 = vmatpush.msra.mxu1 %v2200_v26  ;;  %961 = vmatpush.msra.mxu2 %v2224_v30  ;;  %v3095_v26 = vld [vmem:[%s4005_s3 + $0xb8] sm:$0xff] }
  0x53   : > { %981 = vmatpush.msra.mxu3 %v2225_v35  ;;  %1003 = vmatpush.msra.mxu0 %v2224_v30 }
  0x54   : > { %837 = vmatpush.msra.mxu1 %v2198_v27  ;;  %962 = vmatpush.msra.mxu2 %v2222_v31  ;;  %v3102_v27 = vld [vmem:[%s4005_s3 + $0x1c0] sm:$0xff] }
  0x55   : > { %982 = vmatpush.msra.mxu3 %v2223_v36  ;;  %1004 = vmatpush.msra.mxu0 %v2222_v31 }
  0x56   : > { %838 = vmatpush.msra.mxu1 %v2196_v28  ;;  %963 = vmatpush.msra.mxu2 %v2220_v32  ;;  %v3107_v28 = vld [vmem:[%s4005_s3 + $0x1c8] sm:$0xff] }
  0x57   : > { %983 = vmatpush.msra.mxu3 %v2221_v37  ;;  %1005 = vmatpush.msra.mxu0 %v2220_v32 }
  0x58   : > { %2214 = vmatmul.msk.f32.vlgmr.msra.gmra.mxu1 %vm354_vm1, %v2815_v20  ;;  %2233 = vmatmul.msk.f32.vlgmr.msra.gmra.mxu2 %vm354_vm1, %v2815_v20 }
  0x59   : > { %2235 = vmatmul.msk.f32.vlgmr.msra.gmra.mxu3 %vm354_vm1, %v2815_v20  ;;  %2237 = vmatmul.msk.f32.vlgmr.msra.gmra.mxu0 %vm354_vm1, %v2907_v33 }
  0x5a   : > { %2230 = vmatpush.msk.msrb.mxu1 %vm358_vm0, %v2227_v34  ;;  %2241 = vmatpush.msk.msrb.mxu2 %vm358_vm0, %v2226_v29 }
  0x5b   : > { %2243 = vmatpush.msk.msrb.mxu3 %vm358_vm0, %v2227_v34  ;;  %2253 = vmatpush.msk.msrb.mxu0 %vm358_vm0, %v2251_v38 }
  0x5c   : > { %939 = vmatpush.msrb.mxu1 %v2225_v35  ;;  %1049 = vmatpush.msrb.mxu2 %v2224_v30  ;;  %v3116_v30 = vld [vmem:[%s4005_s3 + $0x1b0] sm:$0xff] }
  0x5d   : > { %1069 = vmatpush.msrb.mxu3 %v2225_v35  ;;  %1106 = vmatpush.msrb.mxu0 %v2249_v39 }
  0x5e   : > { %940 = vmatpush.msrb.mxu1 %v2223_v36  ;;  %1050 = vmatpush.msrb.mxu2 %v2222_v31  ;;  %v3121_v31 = vld [vmem:[%s4005_s3 + $0x1b8] sm:$0xff] }
  0x5f   : > { %1070 = vmatpush.msrb.mxu3 %v2223_v36  ;;  %1107 = vmatpush.msrb.mxu0 %v2247_v40 }
  0x60   : > { %941 = vmatpush.msrb.mxu1 %v2221_v37  ;;  %1051 = vmatpush.msrb.mxu2 %v2220_v32 }
  0x61   : > { %1071 = vmatpush.msrb.mxu3 %v2221_v37  ;;  %1108 = vmatpush.msrb.mxu0 %v2245_v41 }
  0x62   : > { %2231 = vmatmul.msk.f32.vlgmr.msrb.gmra.mxu1 %vm354_vm1, %v2788_v19  ;;  %2242 = vmatmul.msk.f32.vlgmr.msrb.gmra.mxu2 %vm354_vm1, %v2240_v42  ;;  %v3071_v19 = vld [vmem:[%s4005_s3 + $0xc8] sm:$0xff] }
  0x63   : > { %2244 = vmatmul.msk.f32.vlgmr.msrb.gmra.mxu3 %vm354_vm1, %v2240_v42  ;;  %2254 = vmatmul.msk.f32.vlgmr.msrb.gmra.mxu0 %vm354_vm1, %v2815_v20 }
  0x64   : > { %2238 = vmatpush.msk.msra.mxu1 %vm358_vm0, %v2227_v34  ;;  %2257 = vmatpush.msk.msra.mxu2 %vm358_vm0, %v2251_v38  ;;  %v3126_v34 = vld [vmem:[%s4005_s3 + $0xa0] sm:$0xff] }
  0x65   : > { %2259 = vmatpush.msk.msra.mxu3 %vm358_vm0, %v2252_v43  ;;  %2261 = vmatpush.msk.msra.mxu0 %vm358_vm0, %v2251_v38 }
  0x66   : > { %1023 = vmatpush.msra.mxu1 %v2225_v35  ;;  %1148 = vmatpush.msra.mxu2 %v2249_v39  ;;  %v3131_v35 = vld [vmem:[%s4005_s3 + $0xa8] sm:$0xff] }
  0x67   : > { %1168 = vmatpush.msra.mxu3 %v2250_v44  ;;  %1190 = vmatpush.msra.mxu0 %v2249_v39 }
  0x68   : > { %1024 = vmatpush.msra.mxu1 %v2223_v36  ;;  %1149 = vmatpush.msra.mxu2 %v2247_v40 }
  0x69   : > { %1169 = vmatpush.msra.mxu3 %v2248_v45  ;;  %1191 = vmatpush.msra.mxu0 %v2247_v40 }
  0x6a   : > { %1025 = vmatpush.msra.mxu1 %v2221_v37  ;;  %1150 = vmatpush.msra.mxu2 %v2245_v41  ;;  %v3140_v37 = vld [vmem:[%s4005_s3 + $0x1a0] sm:$0xff] }
  0x6b   : > { %1170 = vmatpush.msra.mxu3 %v2246_v46  ;;  %1192 = vmatpush.msra.mxu0 %v2245_v41 }
  0x6c   : > { %2239 = vmatmul.msk.f32.vlgmr.msra.gmra.mxu1 %vm354_vm1, %v2907_v33  ;;  %2258 = vmatmul.msk.f32.vlgmr.msra.gmra.mxu2 %vm354_vm1, %v2907_v33 }
  0x6d   : > { %2260 = vmatmul.msk.f32.vlgmr.msra.gmra.mxu3 %vm354_vm1, %v2907_v33  ;;  %2262 = vmatmul.msk.f32.vlgmr.msra.gmra.mxu0 %vm354_vm1, %v2240_v42 }
  0x6e   : > { %2255 = vmatpush.msk.msrb.mxu1 %vm358_vm0, %v2252_v43  ;;  %2266 = vmatpush.msk.msrb.mxu2 %vm358_vm0, %v2251_v38  ;;  %v3145_v38 = vld [vmem:[%s4005_s3 + $0x1a8] sm:$0xff] }
  0x6f   : > { %2268 = vmatpush.msk.msrb.mxu3 %vm358_vm0, %v2252_v43 }
  0x70   : > { %1126 = vmatpush.msrb.mxu1 %v2250_v44  ;;  %1236 = vmatpush.msrb.mxu2 %v2249_v39 }
  0x71   : > { %1256 = vmatpush.msrb.mxu3 %v2250_v44 }
  0x72   : > { %1127 = vmatpush.msrb.mxu1 %v2248_v45  ;;  %1237 = vmatpush.msrb.mxu2 %v2247_v40 }
  0x73   : > { %1257 = vmatpush.msrb.mxu3 %v2248_v45 }
  0x74   : > { %1128 = vmatpush.msrb.mxu1 %v2246_v46  ;;  %1238 = vmatpush.msrb.mxu2 %v2245_v41  ;;  %v3150_v41 = vld [vmem:[%s4005_s3 + $0x90] sm:$0xff] }
  0x75   : > { %1258 = vmatpush.msrb.mxu3 %v2246_v46  ;;  %2256 = vmatmul.msk.f32.vlgmr.msrb.gmra.mxu1 %vm354_vm1, %v2815_v20  ;;  %v3076_v20 = vld [vmem:[%s4005_s3 + $0x1d0] sm:$0xff] }
  0x76   : > { %2267 = vmatmul.msk.f32.vlgmr.msrb.gmra.mxu2 %vm354_vm1, %v2265_v47  ;;  %2269 = vmatmul.msk.f32.vlgmr.msrb.gmra.mxu3 %vm354_vm1, %v2265_v47 }
  0x77   : > { %2263 = vmatpush.msk.msra.mxu1 %vm358_vm0, %v2252_v43  ;;  %1405 = vmatpush.msra.mxu2 %v3044_v14 }
  0x78   : > { %1425 = vmatpush.msra.mxu3 %v3049_v15  ;;  %1362 = vmatpush.msrb.mxu0 %v3076_v20 }
  0x79   : > { %1210 = vmatpush.msra.mxu1 %v2250_v44  ;;  %1406 = vmatpush.msra.mxu2 %v3054_v16  ;;  %v3164_v44 = vld [vmem:[%s4005_s3 + $0x190] sm:$0xff] }
  0x7a   : > { %1426 = vmatpush.msra.mxu3 %v3061_v17  ;;  %1363 = vmatpush.msrb.mxu0 %v3102_v27 }
  0x7b   : > { %1211 = vmatpush.msra.mxu1 %v2248_v45  ;;  %1407 = vmatpush.msra.mxu2 %v3066_v18  ;;  %v3169_v45 = vld [vmem:[%s4005_s3 + $0x198] sm:$0xff] }
  0x7c   : > { %1427 = vmatpush.msra.mxu3 %v3071_v19  ;;  %1364 = vmatpush.msrb.mxu0 %v3116_v30 }
  0x7d   : > { %1212 = vmatpush.msra.mxu1 %v2246_v46  ;;  %1408 = vmatpush.msra.mxu2 %v3085_v22 }
  0x7e   : > { %2264 = vmatmul.msk.f32.vlgmr.msra.gmra.mxu1 %vm354_vm1, %v2240_v42  ;;  %1428 = vmatpush.msra.mxu3 %v3095_v26  ;;  %v3155_v42 = vld [vmem:[%s4005_s3 + $0x98] sm:$0xff] }
  0x7f   : > { %1382 = vmatpush.msrb.mxu1 %v3090_v23  ;;  %1409 = vmatpush.msra.mxu2 %v3126_v34 }
  0x80   : > { %1429 = vmatpush.msra.mxu3 %v3131_v35  ;;  %1365 = vmatpush.msrb.mxu0 %v3140_v37 }
  0x81   : > { %1383 = vmatpush.msrb.mxu1 %v3107_v28  ;;  %1410 = vmatpush.msra.mxu2 %v3150_v41 }
  0x82   : > { %1430 = vmatpush.msra.mxu3 %v3155_v42  ;;  %1366 = vmatpush.msrb.mxu0 %v3164_v44 }
  0x83   : > { %1384 = vmatpush.msrb.mxu1 %v3121_v31 }
  0x85   : > { %1385 = vmatpush.msrb.mxu1 %v3145_v38 }
  0x87   : > { %1386 = vmatpush.msrb.mxu1 %v3169_v45 }
  0x99   : > { %v382_v48 = vpop.f32.mrf.mxu1 }
  0x9a   : > { %v474_v52 = vpop.f32.mrf.mxu0 }
  0x9f   : > { %v431_v49 = vpop.f32.mrf.mxu2 }
  0xa0   : > { %v2999_v51 = vpop.f32.mrf.mxu3  ;;  %v432_v24 = vadd.f32 %v431_v49, %v382_v48  ;;  %v3176_v49 = vld [vmem:[%s4005_s3 + $0x80] sm:$0xff] }
  0xa1   : > { %1411 = vmatpush.msra.mxu2 %v3176_v49 }
  0xa3   : > { %v2997_v50 = vpop.f32.mrf.mxu1 }
  0xa4   : > { %v3005_v56 = vpop.f32.mrf.mxu0  ;;  %v452_v46 = vadd.f32 %v2999_v51, %v2997_v50  ;;  %v3190_v50 = vld [vmem:[%s4005_s3 + $0x180] sm:$0xff] }
  0xa5   : > { %1367 = vmatpush.msrb.mxu0 %v3190_v50 }
  0xa9   : > { %v514_v53 = vpop.f32.mrf.mxu2 }
  0xaa   : > { %v3003_v55 = vpop.f32.mrf.mxu3  ;;  %v515_v25 = vadd.f32 %v514_v53, %v474_v52  ;;  %v3181_v52 = vld [vmem:[%s4005_s3 + $0x88] sm:$0xff] }
  0xab   : > { %1431 = vmatpush.msra.mxu3 %v3181_v52 }
  0xad   : > { %v3001_v54 = vpop.f32.mrf.mxu1 }
  0xae   : > { %v3013_v60 = vpop.f32.mrf.mxu0  ;;  %v535_v51 = vadd.f32 %v3003_v55, %v3001_v54 }
  0xb3   : > { %v3007_v57 = vpop.f32.mrf.mxu2 }
  0xb4   : > { %v3011_v59 = vpop.f32.mrf.mxu3  ;;  %v598_v54 = vadd.f32 %v3007_v57, %v3005_v56 }
  0xb7   : > { %v3009_v58 = vpop.f32.mrf.mxu1 }
  0xb8   : > { %v736_v0 = vpop.f32.mrf.mxu0 }
  0xb9   : > { %v759_v32 = vadd.f32 %v736_v0, %v432_v24 }
  0xbd   : > { %v3015_v61 = vpop.f32.mrf.mxu2 }
  0xbe   : > { %v3019_v63 = vpop.f32.mrf.mxu3  ;;  %v682_v24 = vadd.f32 %v3015_v61, %v3013_v60 }
  0xc1   : > { %v3017_v62 = vpop.f32.mrf.mxu1 }
  0xc2   : > { %v3025_v4 = vpop.f32.mrf.mxu0 }
  0xc3   : > { %v843_v60 = vadd.f32 %v3025_v4, %v598_v54 }
  0xc7   : > { %v778_v1 = vpop.f32.mrf.mxu2 }
  0xc8   : > { %v3023_v3 = vpop.f32.mrf.mxu3  ;;  %v801_v33 = vadd.f32 %v778_v1, %v515_v25  ;;  %v3200_v1 = vld [vmem:[%s4005_s3 + $0x70] sm:$0xff]  ;;  %v3232_v25 = vld [vmem:[%s4005_s3 + $0x60] sm:$0xff] }
  0xc9   : > { %v802_v56 = vadd.f32 %v3023_v3, %v535_v51  ;;  %1412 = vmatpush.msra.mxu2 %v3200_v1  ;;  %v3246_v3 = vld [vmem:[%s4005_s3 + $0x178] sm:$0xff]  ;;  %v3285_v51 = vld [vmem:[%s4005_s3 + $0x40] sm:$0xff] }
  0xcb   : > { %v3021_v2 = vpop.f32.mrf.mxu1  ;;  %1413 = vmatpush.msra.mxu2 %v3232_v25 }
  0xcc   : > { %v923_v8 = vpop.f32.mrf.mxu0  ;;  %v760_v53 = vadd.f32 %v3021_v2, %v452_v46  ;;  %v3216_v2 = vld [vmem:[%s4005_s3 + $0x188] sm:$0xff] }
  0xcd   : > { %v946_v39 = vadd.f32 %v923_v8, %v759_v32  ;;  %v3205_v8 = vld [vmem:[%s4005_s3 + $0x78] sm:$0xff]  ;;  %v3237_v32 = vld [vmem:[%s4005_s3 + $0x68] sm:$0xff]  ;;  %1387 = vmatpush.msrb.mxu1 %v3216_v2 }
  0xce   : > { %1432 = vmatpush.msra.mxu3 %v3205_v8 }
  0xcf   : > { %1388 = vmatpush.msrb.mxu1 %v3246_v3 }
  0xd0   : > { %1433 = vmatpush.msra.mxu3 %v3237_v32 }
  0xd1   : > { %v3027_v5 = vpop.f32.mrf.mxu2 }
  0xd2   : > { %v3031_v7 = vpop.f32.mrf.mxu3 }
  0xd5   : > { %v3029_v6 = vpop.f32.mrf.mxu1 }
  0xd6   : > { %v3037_v12 = vpop.f32.mrf.mxu0 }
  0xd7   : > { %v1030_v46 = vadd.f32 %v3037_v12, %v843_v60  ;;  %v618_v12 = vadd.f32 %v3011_v59, %v3009_v58  ;;  %v3311_v58 = vld [vmem:[%s4005_s3 + $0x38] sm:$0xff]  ;;  %v3319_v59 = vld [vmem:[%s4005_s3 + $0x140] sm:$0xff]  ;;  %v702_v60 = vadd.f32 %v3019_v63, %v3017_v62  ;;  %v3343_v62 = vld [vmem:[%s4005_s3 + $0x148] sm:$0xff] }
  0xd8   : > { %v3348_v63 = vld [vmem:[%s4005_s3 + $0x130] sm:$0xff] }
  0xdb   : > { %v965_v9 = vpop.f32.mrf.mxu2 }
  0xdc   : > { %v3035_v11 = vpop.f32.mrf.mxu3  ;;  %v988_v40 = vadd.f32 %v965_v9, %v801_v33  ;;  %v3221_v9 = vld [vmem:[%s4005_s3 + $0x170] sm:$0xff]  ;;  %v889_v33 = vadd.f32 %v3027_v5, %v682_v24  ;;  %v3272_v5 = vld [vmem:[%s4005_s3 + $0x168] sm:$0xff] }
  0xdd   : > { %1368 = vmatpush.msrb.mxu0 %v3221_v9  ;;  %1389 = vmatpush.msrb.mxu1 %v3272_v5 }
  0xdf   : > { %v3033_v10 = vpop.f32.mrf.mxu1 }
  0xe0   : > { %v1110_v36 = vpop.f32.mrf.mxu0  ;;  %v947_v57 = vadd.f32 %v3033_v10, %v760_v53  ;;  %v3251_v10 = vld [vmem:[%s4005_s3 + $0x160] sm:$0xff]  ;;  %v3290_v53 = vld [vmem:[%s4005_s3 + $0x48] sm:$0xff] }
  0xe1   : > { %v1133_v47 = vadd.f32 %v1110_v36, %v946_v39  ;;  %v989_v36 = vadd.f32 %v3035_v11, %v802_v56  ;;  %v3259_v39 = vld [vmem:[%s4005_s3 + $0x50] sm:$0xff]  ;;  %1369 = vmatpush.msrb.mxu0 %v3251_v10 }
  0xe2   : > { %v3277_v11 = vld [vmem:[%s4005_s3 + $0x150] sm:$0xff]  ;;  %1414 = vmatpush.msra.mxu2 %v3259_v39 }
  0xe3   : > { %1370 = vmatpush.msrb.mxu0 %v3277_v11 }
  0xe4   : > { %1415 = vmatpush.msra.mxu2 %v3285_v51 }
  0xe5   : > { %v3039_v13 = vpop.f32.mrf.mxu2  ;;  %1371 = vmatpush.msrb.mxu0 %v3319_v59 }
  0xe6   : > { %v3109_v29 = vpop.f32.mrf.mxu3 }
  0xe7   : > { %1372 = vmatpush.msrb.mxu0 %v3348_v63 }
  0xe9   : > { %v3078_v21 = vpop.f32.mrf.mxu1 }
  0xef   : > { %v1152_v43 = vpop.f32.mrf.mxu2 }
  0xf0   : > { %v1175_v48 = vadd.f32 %v1152_v43, %v988_v40  ;;  %v1172_v61 = vpop.f32.mrf.mxu3  ;;  %v3264_v40 = vld [vmem:[%s4005_s3 + $0x58] sm:$0xff]  ;;  %v1194_v43 = vpop.f32.mrf.mxu0 }
  0xf1   : > { %1434 = vmatpush.msra.mxu3 %v3264_v40 }
  0xf2   : > { %v3195_v0 = vmax.f32 %v1133_v47, %v1175_v48  ;;  %v1130_v55 = vpop.f32.mrf.mxu1  ;;  %v1076_v47 = vadd.f32 %v3039_v13, %v889_v33  ;;  %v1176_v48 = vadd.f32 %v1172_v61, %v989_v36  ;;  %v3300_v13 = vld [vmem:[%s4005_s3 + $0x158] sm:$0xff]  ;;  %v844_v61 = vadd.f32 %v3029_v6, %v618_v12  ;;  %v3331_v36 = vld [vmem:[%s4005_s3 + $0x20] sm:$0xff] }
  0xf3   : > { %v1134_v4 = vadd.f32 %v1130_v55, %v947_v57  ;;  %v1217_v55 = vadd.f32 %v1194_v43, %v1030_v46  ;;  %v3306_v57 = vld [vmem:[%s4005_s3 + $0x30] sm:$0xff]  ;;  %1435 = vmatpush.msra.mxu3 %v3290_v53  ;;  %1390 = vmatpush.msrb.mxu1 %v3300_v13  ;;  %v890_v6 = vadd.f32 %v3031_v7, %v702_v60  ;;  %v3370_v7 = vld [vmem:[%s4005_s3 + $0x138] sm:$0xff]  ;;  %v3397_v60 = vld [vmem:[%s4005_s3 + $0x128] sm:$0xff] }
  0xf4   : > { %1272 = vrot.lane.b32.xlu0 %v3195_v0, %s2556_s24  ;;  %1416 = vmatpush.msra.mxu2 %v3306_v57  ;;  %v1031_v46 = vadd.f32 %v3078_v21, %v844_v61  ;;  %v3375_v21 = vld [vmem:[%s4005_s3 + $0x120] sm:$0xff]  ;;  %v3402_v61 = vld [vmem:[%s4005_s3 + $0x110] sm:$0xff] }
  0xf5   : > { %v1266_v24 = vmax.f32 %v1134_v4, %v1176_v48  ;;  %v3336_v4 = vld [vmem:[%s4005_s3 + $0x28] sm:$0xff]  ;;  %1436 = vmatpush.msra.mxu3 %v3311_v58  ;;  %v3363_v48 = vld [vmem:[%s4005_s3 + $0x18] sm:$0xff]  ;;  %1391 = vmatpush.msrb.mxu1 %v3343_v62 }
  0xf6   : > { %1417 = vmatpush.msra.mxu2 %v3331_v36  ;;  %1373 = vmatpush.msrb.mxu0 %v3375_v21 }
  0xf7   : > { %1437 = vmatpush.msra.mxu3 %v3336_v4  ;;  %1392 = vmatpush.msrb.mxu1 %v3370_v7 }
  0xf8   : > { %1374 = vmatpush.msrb.mxu0 %v3402_v61 }
  0xf9   : > { %v1240_v54 = vpop.f32.mrf.mxu2  ;;  %v1260_v12 = vpop.f32.mrf.mxu3  ;;  %1438 = vmatpush.msra.mxu3 %v3363_v48  ;;  %1393 = vmatpush.msrb.mxu1 %v3397_v60 }
  0xfa   : > { %v1263_v56 = vadd.f32 %v1240_v54, %v1076_v47  ;;  %v3358_v47 = vld [vmem:[%s4005_s3 + $0x10] sm:$0xff]  ;;  %v1077_v54 = vadd.f32 %v3109_v29, %v890_v6  ;;  %v3411_v6 = vld [vmem:[%s4005_s3 + $0x118] sm:$0xff] }
  0xfb   : > { %v1214_v43 = vpop.f32.mrf.mxu1  ;;  %1418 = vmatpush.msra.mxu2 %v3358_v47  ;;  %1394 = vmatpush.msrb.mxu1 %v3411_v6 }
  0xfc   : > { %v3324_v33 = vmax.f32 %v1217_v55, %v1263_v56  ;;  %1274 = vrot.lane.b32.xlu0 %v1266_v24, %s2556_s24  ;;  %v1218_v55 = vadd.f32 %v1214_v43, %v1031_v46  ;;  %v3383_v24 = vld [vmem:[%s4005_s3] sm:$0xff]  ;;  %v3388_v56 = vld [vmem:[%s4005_s3 + $0x8] sm:$0xff]  ;;  %v1264_v29 = vadd.f32 %v1260_v12, %v1077_v54 }
  0xfd   : > { %1419 = vmatpush.msra.mxu2 %v3383_v24  ;;  %1439 = vmatpush.msra.mxu3 %v3388_v56  ;;  %v3418_v46 = vld [vmem:[%s4005_s3 + $0x100] sm:$0xff]  ;;  %v2369_v12 = vld [vmem:[%s4005_s3 + $0x3a8] sm:$0xff] }
  0xfe   : > { %1287 = vrot.lane.b32.xlu1 %v3324_v33, %s2556_s24  ;;  %v1268_v43 = vmax.f32 %v1218_v55, %v1264_v29  ;;  %1375 = vmatpush.msrb.mxu0 %v3418_v46  ;;  %v2364_v54 = vld [vmem:[%s4005_s3 + $0x380] sm:$0xff]  ;;  %v2365_v55 = vld [vmem:[%s4005_s3 + $0x388] sm:$0xff] }
  0xff   : > { %1488 = vmatpush.msrb.mxu2 %v3044_v14  ;;  %1508 = vmatpush.msrb.mxu3 %v3049_v15  ;;  %v2273_v14 = vld [vmem:[%s4005_s3 + $0x108] sm:$0xff]  ;;  %v2270_v15 = vld [vmem:[%s4005_s3 + $0xf0] sm:$0xff]  ;;  %v2360_v29 = vld [vmem:[%s4005_s3 + $0x360] sm:$0xff] }
 0x100   : > { %1395 = vmatpush.msrb.mxu1 %v2273_v14  ;;  %1376 = vmatpush.msrb.mxu0 %v2270_v15 }
 0x101   : > { %1489 = vmatpush.msrb.mxu2 %v3054_v16  ;;  %1509 = vmatpush.msrb.mxu3 %v3061_v17  ;;  %v2271_v16 = vld [vmem:[%s4005_s3 + $0xf8] sm:$0xff] }
 0x102   : > { %1396 = vmatpush.msrb.mxu1 %v2271_v16  ;;  %1448 = vmatpush.msra.mxu0 %v3076_v20 }
 0x103   : > { %1490 = vmatpush.msrb.mxu2 %v3066_v18  ;;  %1510 = vmatpush.msrb.mxu3 %v3071_v19  ;;  %v2490_v18 = vld [vmem:[%s4004_s2] ss:$0 sm:$0xff] }
 0x104   : > { %1468 = vmatpush.msra.mxu1 %v3090_v23  ;;  %1449 = vmatpush.msra.mxu0 %v3102_v27 }
 0x105   : > { %1491 = vmatpush.msrb.mxu2 %v3085_v22  ;;  %1511 = vmatpush.msrb.mxu3 %v3095_v26 }
 0x106   : > { %1289 = vrot.lane.b32.xlu1 %v1268_v43, %s2556_s24  ;;  %1469 = vmatpush.msra.mxu1 %v3107_v28  ;;  %v2336_v28 = vld [vmem:[%s4005_s3 + $0x2c0] sm:$0xff]  ;;  %v2359_v43 = vld [vmem:[%s4005_s3 + $0x358] sm:$0xff]  ;;  %s324_s24 = scalar_lea.vmem [#allocation2], %s323_s26 }
 0x107   : > { %1492 = vmatpush.msrb.mxu2 %v3126_v34  ;;  %1512 = vmatpush.msrb.mxu3 %v3131_v35  ;;  %v2335_v34 = vld [vmem:[%s4005_s3 + $0x2b8] sm:$0xff] }
 0x108   : > { %1450 = vmatpush.msra.mxu0 %v3116_v30  ;;  %1470 = vmatpush.msra.mxu1 %v3121_v31  ;;  %v2337_v30 = vld [vmem:[%s4005_s3 + $0x2c8] sm:$0xff]  ;;  %v2334_v31 = vld [vmem:[%s4005_s3 + $0x2b0] sm:$0xff] }
 0x109   : > { %1493 = vmatpush.msrb.mxu2 %v3150_v41  ;;  %1513 = vmatpush.msrb.mxu3 %v3155_v42 }
 0x10a   : > { %1451 = vmatpush.msra.mxu0 %v3140_v37  ;;  %1471 = vmatpush.msra.mxu1 %v3145_v38  ;;  %v2332_v37 = vld [vmem:[%s4005_s3 + $0x2a0] sm:$0xff]  ;;  %v2333_v38 = vld [vmem:[%s4005_s3 + $0x2a8] sm:$0xff] }
 0x10b   : > { %1494 = vmatpush.msrb.mxu2 %v3176_v49  ;;  %1514 = vmatpush.msrb.mxu3 %v3181_v52  ;;  %v2328_v52 = vld [vmem:[%s4005_s3 + $0x280] sm:$0xff] }
 0x10c   : > { %1452 = vmatpush.msra.mxu0 %v3164_v44  ;;  %1472 = vmatpush.msra.mxu1 %v3169_v45  ;;  %v2330_v44 = vld [vmem:[%s4005_s3 + $0x290] sm:$0xff]  ;;  %v2331_v45 = vld [vmem:[%s4005_s3 + $0x298] sm:$0xff] }
 0x10d   : > { %1495 = vmatpush.msrb.mxu2 %v3200_v1  ;;  %1515 = vmatpush.msrb.mxu3 %v3205_v8  ;;  %v2326_v1 = vld [vmem:[%s4005_s3 + $0x270] sm:$0xff]  ;;  %v2327_v8 = vld [vmem:[%s4005_s3 + $0x278] sm:$0xff] }
 0x10e   : > { %1453 = vmatpush.msra.mxu0 %v3190_v50  ;;  %1473 = vmatpush.msra.mxu1 %v3216_v2  ;;  %v2329_v50 = vld [vmem:[%s4005_s3 + $0x288] sm:$0xff]  ;;  %v2324_v2 = vld [vmem:[%s4005_s3 + $0x260] sm:$0xff] }
 0x10f   : > { %1496 = vmatpush.msrb.mxu2 %v3232_v25  ;;  %1516 = vmatpush.msrb.mxu3 %v3237_v32  ;;  %v2322_v25 = vld [vmem:[%s4005_s3 + $0x250] sm:$0xff]  ;;  %v2323_v32 = vld [vmem:[%s4005_s3 + $0x258] sm:$0xff] }
 0x110   : > { %1454 = vmatpush.msra.mxu0 %v3221_v9  ;;  %1474 = vmatpush.msra.mxu1 %v3246_v3  ;;  %v2325_v9 = vld [vmem:[%s4005_s3 + $0x268] sm:$0xff] }
 0x111   : > { %1497 = vmatpush.msrb.mxu2 %v3259_v39  ;;  %1517 = vmatpush.msrb.mxu3 %v3264_v40  ;;  %v2321_v39 = vld [vmem:[%s4005_s3 + $0x248] sm:$0xff]  ;;  %v2318_v40 = vld [vmem:[%s4005_s3 + $0x230] sm:$0xff] }
 0x112   : > { %1455 = vmatpush.msra.mxu0 %v3251_v10  ;;  %1475 = vmatpush.msra.mxu1 %v3272_v5  ;;  %v2320_v10 = vld [vmem:[%s4005_s3 + $0x240] sm:$0xff]  ;;  %v2319_v5 = vld [vmem:[%s4005_s3 + $0x238] sm:$0xff] }
 0x113   : > { %1498 = vmatpush.msrb.mxu2 %v3285_v51  ;;  %1518 = vmatpush.msrb.mxu3 %v3290_v53  ;;  %v2317_v51 = vld [vmem:[%s4005_s3 + $0x228] sm:$0xff]  ;;  %v2314_v53 = vld [vmem:[%s4005_s3 + $0x210] sm:$0xff] }
 0x114   : > { %1456 = vmatpush.msra.mxu0 %v3277_v11  ;;  %1476 = vmatpush.msra.mxu1 %v3300_v13  ;;  %v2316_v11 = vld [vmem:[%s4005_s3 + $0x220] sm:$0xff]  ;;  %v2315_v13 = vld [vmem:[%s4005_s3 + $0x218] sm:$0xff] }
 0x115   : > { %1499 = vmatpush.msrb.mxu2 %v3306_v57  ;;  %1519 = vmatpush.msrb.mxu3 %v3311_v58  ;;  %v2312_v57 = vld [vmem:[%s4005_s3 + $0x200] sm:$0xff]  ;;  %v2313_v58 = vld [vmem:[%s4005_s3 + $0x208] sm:$0xff] }
 0x116   : > { %1457 = vmatpush.msra.mxu0 %v3319_v59  ;;  %1477 = vmatpush.msra.mxu1 %v3343_v62  ;;  %v2310_v59 = vld [vmem:[%s4005_s3 + $0x1f0] sm:$0xff] }
 0x117   : > { %1500 = vmatpush.msrb.mxu2 %v3331_v36  ;;  %1520 = vmatpush.msrb.mxu3 %v3336_v4  ;;  %v2308_v36 = vld [vmem:[%s4005_s3 + $0x1e0] sm:$0xff]  ;;  %v2309_v4 = vld [vmem:[%s4005_s3 + $0x1e8] sm:$0xff] }
 0x118   : > { %1458 = vmatpush.msra.mxu0 %v3348_v63  ;;  %1478 = vmatpush.msra.mxu1 %v3370_v7  ;;  %v2370_v63 = vld [vmem:[%s4005_s3 + $0x3b0] sm:$0xff] }
 0x119   : > { %1501 = vmatpush.msrb.mxu2 %v3358_v47  ;;  %1521 = vmatpush.msrb.mxu3 %v3363_v48  ;;  %v2371_v47 = vld [vmem:[%s4005_s3 + $0x3b8] sm:$0xff]  ;;  %v2368_v48 = vld [vmem:[%s4005_s3 + $0x3a0] sm:$0xff]  ;;  %v2366_v7 = vld [vmem:[%s4005_s3 + $0x390] sm:$0xff] }
 0x11a   : > { %1459 = vmatpush.msra.mxu0 %v3375_v21  ;;  %1479 = vmatpush.msra.mxu1 %v3397_v60  ;;  %v2367_v21 = vld [vmem:[%s4005_s3 + $0x398] sm:$0xff]  ;;  %v2361_v60 = vld [vmem:[%s4005_s3 + $0x368] sm:$0xff] }
 0x11b   : > { %1502 = vmatpush.msrb.mxu2 %v3383_v24  ;;  %1522 = vmatpush.msrb.mxu3 %v3388_v56  ;;  %v2362_v24 = vld [vmem:[%s4005_s3 + $0x370] sm:$0xff]  ;;  %v2363_v56 = vld [vmem:[%s4005_s3 + $0x378] sm:$0xff] }
 0x11c   : > { %1460 = vmatpush.msra.mxu0 %v3402_v61  ;;  %1480 = vmatpush.msra.mxu1 %v3411_v6  ;;  %v2358_v61 = vld [vmem:[%s4005_s3 + $0x350] sm:$0xff]  ;;  %v2356_v6 = vld [vmem:[%s4005_s3 + $0x340] sm:$0xff] }
 0x11e   : > { %1461 = vmatpush.msra.mxu0 %v3418_v46  ;;  %1481 = vmatpush.msra.mxu1 %v2273_v14  ;;  %v2357_v46 = vld [vmem:[%s4005_s3 + $0x348] sm:$0xff]  ;;  %v2354_v14 = vld [vmem:[%s4005_s3 + $0x330] sm:$0xff] }
 0x120   : > { %1462 = vmatpush.msra.mxu0 %v2270_v15  ;;  %1482 = vmatpush.msra.mxu1 %v2271_v16  ;;  %v2355_v15 = vld [vmem:[%s4005_s3 + $0x338] sm:$0xff]  ;;  %v2352_v16 = vld [vmem:[%s4005_s3 + $0x320] sm:$0xff] }
 0x166   : > { %v1273_v17 = vpop.permute.xlu0 %1272 }
 0x16e   : > { %v1275_v19 = vpop.permute.xlu0 %1274 }
 0x16f   : > { %v1277_v20 = vsel %vm1276_vm2, %v1273_v17, %v1275_v19  ;;  %v2353_v17 = vld [vmem:[%s4005_s3 + $0x328] sm:$0xff]  ;;  %v2351_v19 = vld [vmem:[%s4005_s3 + $0x318] sm:$0xff] }
 0x170   : > { %v1288_v22 = vpop.permute.xlu1 %1287  ;;  %v1279_v23 = vmax.f32 %v3195_v0, %v1277_v20  ;;  %v2348_v20 = vld [vmem:[%s4005_s3 + $0x300] sm:$0xff] }
 0x172   : > { %v1283_v26 = vadd.f32 %v2490_v18, %v1279_v23  ;;  %v2346_v23 = vld [vmem:[%s4005_s3 + $0x2f0] sm:$0xff] }
 0x174   : > { %v3492_v27 = vmax.f32 %v1283_v26, 0.0  ;;  %v2347_v26 = vld [vmem:[%s4005_s3 + $0x2f8] sm:$0xff] }
 0x176   : > { %2302 = vmatmul.msk.f32.vlgmr.msra.gmra.mxu2 %vm1357_vm3, %v3492_v27  ;;  %2303 = vmatmul.msk.f32.vlgmr.msra.gmra.mxu3 %vm1357_vm3, %v3492_v27  ;;  %v3559_v3 = vrot.slane %v3492_v27, 1 }
 0x177   : > { %1604 = vmatpush.msra.mxu2 %v2336_v28  ;;  %1624 = vmatpush.msra.mxu3 %v2337_v30 }
 0x178   : > { %v1290_v35 = vpop.permute.xlu1 %1289 }
 0x179   : > { %v1291_v41 = vsel %vm1276_vm2, %v1288_v22, %v1290_v35  ;;  %1605 = vmatpush.msra.mxu2 %v2334_v31  ;;  %1625 = vmatpush.msra.mxu3 %v2335_v34  ;;  %v2349_v22 = vld [vmem:[%s4005_s3 + $0x308] sm:$0xff]  ;;  %v3709_v35 = vrot.slane %v3492_v27, 2  ;;  %v2402_v27 = vld [vmem:[%s4005_s3 + $0x490] sm:$0xff] }
 0x17a   : > { %v1293_v42 = vmax.f32 %v3324_v33, %v1291_v41  ;;  %v2311_v33 = vld [vmem:[%s4005_s3 + $0x1f8] sm:$0xff] }
 0x17b   : > { %1606 = vmatpush.msra.mxu2 %v2332_v37  ;;  %1626 = vmatpush.msra.mxu3 %v2333_v38  ;;  %v2403_v41 = vld [vmem:[%s4005_s3 + $0x498] sm:$0xff] }
 0x17c   : > { %v1294_v49 = vadd.f32 %v2490_v18, %v1293_v42  ;;  %v2350_v18 = vld [vmem:[%s4005_s3 + $0x310] sm:$0xff]  ;;  %v2400_v42 = vld [vmem:[%s4005_s3 + $0x480] sm:$0xff] }
 0x17d   : > { %1607 = vmatpush.msra.mxu2 %v2330_v44  ;;  %1627 = vmatpush.msra.mxu3 %v2331_v45 }
 0x17e   : > { %v3530_v0 = vmax.f32 %v1294_v49, 0.0  ;;  %v2399_v49 = vld [vmem:[%s4005_s3 + $0x478] sm:$0xff] }
 0x17f   : > { %1608 = vmatpush.msra.mxu2 %v2328_v52  ;;  %1628 = vmatpush.msra.mxu3 %v2329_v50 }
 0x180   : > { %2300 = vmatmul.msk.f32.vlgmr.msrb.gmra.mxu0 %vm1357_vm3, %v3530_v0  ;;  %2301 = vmatmul.msk.f32.vlgmr.msrb.gmra.mxu1 %vm1357_vm3, %v3530_v0  ;;  %v3608_v62 = vrot.slane %v3530_v0, 1 }
 0x181   : > { %2306 = vmatmul.msk.f32.vlgmr.msrb.gmra.mxu2 %vm1357_vm3, %v3530_v0  ;;  %2307 = vmatmul.msk.f32.vlgmr.msrb.gmra.mxu3 %vm1357_vm3, %v3530_v0 }
 0x182   : > { %1559 = vmatpush.msrb.mxu0 %v2336_v28  ;;  %1579 = vmatpush.msrb.mxu1 %v2337_v30  ;;  %v2344_v28 = vld [vmem:[%s4005_s3 + $0x2e0] sm:$0xff]  ;;  %v2345_v30 = vld [vmem:[%s4005_s3 + $0x2e8] sm:$0xff] }
 0x183   : > { %1609 = vmatpush.msra.mxu2 %v2326_v1  ;;  %1629 = vmatpush.msra.mxu3 %v2327_v8 }
 0x184   : > { %1560 = vmatpush.msrb.mxu0 %v2334_v31  ;;  %1580 = vmatpush.msrb.mxu1 %v2335_v34  ;;  %v2342_v31 = vld [vmem:[%s4005_s3 + $0x2d0] sm:$0xff]  ;;  %v2343_v34 = vld [vmem:[%s4005_s3 + $0x2d8] sm:$0xff] }
 0x185   : > { %1610 = vmatpush.msra.mxu2 %v2324_v2  ;;  %1630 = vmatpush.msra.mxu3 %v2325_v9 }
 0x186   : > { %1561 = vmatpush.msrb.mxu0 %v2332_v37  ;;  %1581 = vmatpush.msrb.mxu1 %v2333_v38  ;;  %v2404_v37 = vld [vmem:[%s4005_s3 + $0x4a0] sm:$0xff]  ;;  %v2405_v38 = vld [vmem:[%s4005_s3 + $0x4a8] sm:$0xff] }
 0x187   : > { %1611 = vmatpush.msra.mxu2 %v2322_v25  ;;  %1631 = vmatpush.msra.mxu3 %v2323_v32 }
 0x188   : > { %1562 = vmatpush.msrb.mxu0 %v2330_v44  ;;  %1582 = vmatpush.msrb.mxu1 %v2331_v45  ;;  %v2401_v44 = vld [vmem:[%s4005_s3 + $0x488] sm:$0xff]  ;;  %v2398_v45 = vld [vmem:[%s4005_s3 + $0x470] sm:$0xff] }
 0x189   : > { %2304 = vmatmul.msk.f32.vlgmr.msra.gmra.mxu0 %vm1357_vm3, %v3559_v3  ;;  %2305 = vmatmul.msk.f32.vlgmr.msra.gmra.mxu1 %vm1357_vm3, %v3559_v3 }
 0x18a   : > { %1563 = vmatpush.msrb.mxu0 %v2328_v52  ;;  %1583 = vmatpush.msrb.mxu1 %v2329_v50  ;;  %v2396_v52 = vld [vmem:[%s4005_s3 + $0x460] sm:$0xff]  ;;  %v2397_v50 = vld [vmem:[%s4005_s3 + $0x468] sm:$0xff] }
 0x18b   : > { %1612 = vmatpush.msra.mxu2 %v2320_v10  ;;  %1632 = vmatpush.msra.mxu3 %v2321_v39 }
 0x18c   : > { %1564 = vmatpush.msrb.mxu0 %v2326_v1  ;;  %1584 = vmatpush.msrb.mxu1 %v2327_v8  ;;  %v2394_v1 = vld [vmem:[%s4005_s3 + $0x450] sm:$0xff]  ;;  %v2395_v8 = vld [vmem:[%s4005_s3 + $0x458] sm:$0xff] }
 0x18d   : > { %1613 = vmatpush.msra.mxu2 %v2318_v40  ;;  %1633 = vmatpush.msra.mxu3 %v2319_v5 }
 0x18e   : > { %1565 = vmatpush.msrb.mxu0 %v2324_v2  ;;  %1585 = vmatpush.msrb.mxu1 %v2325_v9  ;;  %v2392_v2 = vld [vmem:[%s4005_s3 + $0x440] sm:$0xff]  ;;  %v2393_v9 = vld [vmem:[%s4005_s3 + $0x448] sm:$0xff] }
 0x18f   : > { %1614 = vmatpush.msra.mxu2 %v2316_v11  ;;  %1634 = vmatpush.msra.mxu3 %v2317_v51 }
 0x190   : > { %1566 = vmatpush.msrb.mxu0 %v2322_v25  ;;  %1586 = vmatpush.msrb.mxu1 %v2323_v32  ;;  %v2390_v25 = vld [vmem:[%s4005_s3 + $0x430] sm:$0xff]  ;;  %v2391_v32 = vld [vmem:[%s4005_s3 + $0x438] sm:$0xff] }
 0x191   : > { %1615 = vmatpush.msra.mxu2 %v2314_v53  ;;  %1635 = vmatpush.msra.mxu3 %v2315_v13 }
 0x192   : > { %1567 = vmatpush.msrb.mxu0 %v2320_v10  ;;  %1587 = vmatpush.msrb.mxu1 %v2321_v39  ;;  %v2389_v10 = vld [vmem:[%s4005_s3 + $0x428] sm:$0xff]  ;;  %v2386_v39 = vld [vmem:[%s4005_s3 + $0x410] sm:$0xff] }
 0x193   : > { %1616 = vmatpush.msra.mxu2 %v2312_v57  ;;  %1636 = vmatpush.msra.mxu3 %v2313_v58 }
 0x194   : > { %1568 = vmatpush.msrb.mxu0 %v2318_v40  ;;  %1588 = vmatpush.msrb.mxu1 %v2319_v5  ;;  %v2387_v40 = vld [vmem:[%s4005_s3 + $0x418] sm:$0xff]  ;;  %v2384_v5 = vld [vmem:[%s4005_s3 + $0x400] sm:$0xff] }
 0x195   : > { %1617 = vmatpush.msra.mxu2 %v2310_v59  ;;  %1637 = vmatpush.msra.mxu3 %v2311_v33 }
 0x196   : > { %1569 = vmatpush.msrb.mxu0 %v2316_v11  ;;  %1589 = vmatpush.msrb.mxu1 %v2317_v51  ;;  %v2385_v11 = vld [vmem:[%s4005_s3 + $0x408] sm:$0xff]  ;;  %v2382_v51 = vld [vmem:[%s4005_s3 + $0x3f0] sm:$0xff] }
 0x197   : > { %1618 = vmatpush.msra.mxu2 %v2308_v36  ;;  %1638 = vmatpush.msra.mxu3 %v2309_v4 }
 0x198   : > { %2340 = vmatmul.msk.f32.vlgmr.msra.gmra.mxu2 %vm1357_vm3, %v3608_v62  ;;  %2341 = vmatmul.msk.f32.vlgmr.msra.gmra.mxu3 %vm1357_vm3, %v3608_v62 }
 0x199   : > { %1722 = vmatpush.msrb.mxu2 %v2370_v63  ;;  %1742 = vmatpush.msrb.mxu3 %v2371_v47 }
 0x19a   : > { %1570 = vmatpush.msrb.mxu0 %v2314_v53  ;;  %1590 = vmatpush.msrb.mxu1 %v2315_v13  ;;  %v2383_v53 = vld [vmem:[%s4005_s3 + $0x3f8] sm:$0xff]  ;;  %v2380_v13 = vld [vmem:[%s4005_s3 + $0x3e0] sm:$0xff] }
 0x19b   : > { %1723 = vmatpush.msrb.mxu2 %v2368_v48  ;;  %1743 = vmatpush.msrb.mxu3 %v2369_v12 }
 0x19c   : > { %1571 = vmatpush.msrb.mxu0 %v2312_v57  ;;  %1591 = vmatpush.msrb.mxu1 %v2313_v58  ;;  %v2381_v57 = vld [vmem:[%s4005_s3 + $0x3e8] sm:$0xff]  ;;  %v2378_v58 = vld [vmem:[%s4005_s3 + $0x3d0] sm:$0xff] }
 0x19d   : > { %1724 = vmatpush.msrb.mxu2 %v2366_v7  ;;  %1744 = vmatpush.msrb.mxu3 %v2367_v21 }
 0x19e   : > { %1572 = vmatpush.msrb.mxu0 %v2310_v59  ;;  %1592 = vmatpush.msrb.mxu1 %v2311_v33  ;;  %v2379_v59 = vld [vmem:[%s4005_s3 + $0x3d8] sm:$0xff]  ;;  %v2376_v33 = vld [vmem:[%s4005_s3 + $0x3c0] sm:$0xff] }
 0x19f   : > { %1725 = vmatpush.msrb.mxu2 %v2364_v54  ;;  %1745 = vmatpush.msrb.mxu3 %v2365_v55 }
 0x1a0   : > { %1573 = vmatpush.msrb.mxu0 %v2308_v36  ;;  %1593 = vmatpush.msrb.mxu1 %v2309_v4  ;;  %v2377_v36 = vld [vmem:[%s4005_s3 + $0x3c8] sm:$0xff]  ;;  %v1836_v4 = vrot.slane %v3530_v0, 2 }
 0x1a1   : > { %2338 = vmatmul.msk.f32.vlgmr.msrb.gmra.mxu0 %vm1357_vm3, %v3559_v3  ;;  %2339 = vmatmul.msk.f32.vlgmr.msrb.gmra.mxu1 %vm1357_vm3, %v3559_v3  ;;  %v2388_v3 = vld [vmem:[%s4005_s3 + $0x420] sm:$0xff] }
 0x1a2   : > { %1677 = vmatpush.msra.mxu0 %v2370_v63  ;;  %1697 = vmatpush.msra.mxu1 %v2371_v47 }
 0x1a3   : > { %1726 = vmatpush.msrb.mxu2 %v2362_v24  ;;  %1746 = vmatpush.msrb.mxu3 %v2363_v56 }
 0x1a4   : > { %1678 = vmatpush.msra.mxu0 %v2368_v48  ;;  %1698 = vmatpush.msra.mxu1 %v2369_v12 }
 0x1a5   : > { %1727 = vmatpush.msrb.mxu2 %v2360_v29  ;;  %1747 = vmatpush.msrb.mxu3 %v2361_v60 }
 0x1a6   : > { %1679 = vmatpush.msra.mxu0 %v2366_v7  ;;  %1699 = vmatpush.msra.mxu1 %v2367_v21  ;;  %v1909_v21 = vld [vmem:[%s4007_s5 + $0x48] sm:$0xff] }
 0x1a7   : > { %1728 = vmatpush.msrb.mxu2 %v2358_v61  ;;  %1748 = vmatpush.msrb.mxu3 %v2359_v43 }
 0x1a8   : > { %1680 = vmatpush.msra.mxu0 %v2364_v54  ;;  %1700 = vmatpush.msra.mxu1 %v2365_v55  ;;  %v1908_v54 = vld [vmem:[%s4007_s5 + $0x40] sm:$0xff]  ;;  %v2420_v55 = vld [vmem:[%s4007_s5 + $0x98] sm:$0xff] }
 0x1a9   : > { %1729 = vmatpush.msrb.mxu2 %v2356_v6  ;;  %1749 = vmatpush.msrb.mxu3 %v2357_v46 }
 0x1aa   : > { %1681 = vmatpush.msra.mxu0 %v2362_v24  ;;  %1701 = vmatpush.msra.mxu1 %v2363_v56 }
 0x1ab   : > { %1730 = vmatpush.msrb.mxu2 %v2354_v14  ;;  %1750 = vmatpush.msrb.mxu3 %v2355_v15 }
 0x1ac   : > { %1682 = vmatpush.msra.mxu0 %v2360_v29  ;;  %1702 = vmatpush.msra.mxu1 %v2361_v60  ;;  %v2431_v29 = vld [vmem:[%s4007_s5 + $0xe8] sm:$0xff]  ;;  %v2442_v60 = vld [vmem:[%s4007_s5 + $0x138] sm:$0xff] }
 0x1ad   : > { %1731 = vmatpush.msrb.mxu2 %v2352_v16  ;;  %1751 = vmatpush.msrb.mxu3 %v2353_v17 }
 0x1ae   : > { %1683 = vmatpush.msra.mxu0 %v2358_v61  ;;  %1703 = vmatpush.msra.mxu1 %v2359_v43 }
 0x1af   : > { %1732 = vmatpush.msrb.mxu2 %v2350_v18  ;;  %1752 = vmatpush.msrb.mxu3 %v2351_v19 }
 0x1b0   : > { %1684 = vmatpush.msra.mxu0 %v2356_v6  ;;  %1704 = vmatpush.msra.mxu1 %v2357_v46 }
 0x1b1   : > { %1733 = vmatpush.msrb.mxu2 %v2348_v20  ;;  %1753 = vmatpush.msrb.mxu3 %v2349_v22 }
 0x1b2   : > { %1685 = vmatpush.msra.mxu0 %v2354_v14  ;;  %1705 = vmatpush.msra.mxu1 %v2355_v15 }
 0x1b3   : > { %1734 = vmatpush.msrb.mxu2 %v2346_v23  ;;  %1754 = vmatpush.msrb.mxu3 %v2347_v26 }
 0x1b4   : > { %1686 = vmatpush.msra.mxu0 %v2352_v16  ;;  %1706 = vmatpush.msra.mxu1 %v2353_v17 }
 0x1b5   : > { %1735 = vmatpush.msrb.mxu2 %v2344_v28  ;;  %1755 = vmatpush.msrb.mxu3 %v2345_v30 }
 0x1b6   : > { %1687 = vmatpush.msra.mxu0 %v2350_v18  ;;  %1707 = vmatpush.msra.mxu1 %v2351_v19 }
 0x1b7   : > { %1736 = vmatpush.msrb.mxu2 %v2342_v31  ;;  %1756 = vmatpush.msrb.mxu3 %v2343_v34 }
 0x1b8   : > { %2374 = vmatmul.msk.f32.vlgmr.msrb.gmra.mxu2 %vm1357_vm3, %v3709_v35  ;;  %2375 = vmatmul.msk.f32.vlgmr.msrb.gmra.mxu3 %vm1357_vm3, %v3709_v35 }
 0x1b9   : > { %1840 = vmatpush.msra.mxu2 %v2404_v37  ;;  %1860 = vmatpush.msra.mxu3 %v2405_v38 }
 0x1ba   : > { %1688 = vmatpush.msra.mxu0 %v2348_v20  ;;  %1708 = vmatpush.msra.mxu1 %v2349_v22 }
 0x1bb   : > { %1841 = vmatpush.msra.mxu2 %v2402_v27  ;;  %1861 = vmatpush.msra.mxu3 %v2403_v41 }
 0x1bc   : > { %1689 = vmatpush.msra.mxu0 %v2346_v23  ;;  %1709 = vmatpush.msra.mxu1 %v2347_v26 }
 0x1bd   : > { %1842 = vmatpush.msra.mxu2 %v2400_v42  ;;  %1862 = vmatpush.msra.mxu3 %v2401_v44 }
 0x1be   : > { %1690 = vmatpush.msra.mxu0 %v2344_v28  ;;  %1710 = vmatpush.msra.mxu1 %v2345_v30 }
 0x1bf   : > { %1843 = vmatpush.msra.mxu2 %v2398_v45  ;;  %1863 = vmatpush.msra.mxu3 %v2399_v49 }
 0x1c0   : > { %1691 = vmatpush.msra.mxu0 %v2342_v31  ;;  %1711 = vmatpush.msra.mxu1 %v2343_v34 }
 0x1c1   : > { %2372 = vmatmul.msk.f32.vlgmr.msra.gmra.mxu0 %vm1357_vm3, %v3608_v62  ;;  %2373 = vmatmul.msk.f32.vlgmr.msra.gmra.mxu1 %vm1357_vm3, %v3608_v62 }
 0x1c2   : > { %1795 = vmatpush.msrb.mxu0 %v2404_v37  ;;  %1815 = vmatpush.msrb.mxu1 %v2405_v38 }
 0x1c3   : > { %1844 = vmatpush.msra.mxu2 %v2396_v52  ;;  %1864 = vmatpush.msra.mxu3 %v2397_v50 }
 0x1c4   : > { %1796 = vmatpush.msrb.mxu0 %v2402_v27  ;;  %1816 = vmatpush.msrb.mxu1 %v2403_v41 }
 0x1c5   : > { %1845 = vmatpush.msra.mxu2 %v2394_v1  ;;  %1865 = vmatpush.msra.mxu3 %v2395_v8 }
 0x1c6   : > { %1797 = vmatpush.msrb.mxu0 %v2400_v42  ;;  %1817 = vmatpush.msrb.mxu1 %v2401_v44 }
 0x1c7   : > { %1846 = vmatpush.msra.mxu2 %v2392_v2  ;;  %1866 = vmatpush.msra.mxu3 %v2393_v9 }
 0x1c8   : > { %1798 = vmatpush.msrb.mxu0 %v2398_v45  ;;  %1818 = vmatpush.msrb.mxu1 %v2399_v49 }
 0x1c9   : > { %1847 = vmatpush.msra.mxu2 %v2390_v25  ;;  %1867 = vmatpush.msra.mxu3 %v2391_v32 }
 0x1ca   : > { %1799 = vmatpush.msrb.mxu0 %v2396_v52  ;;  %1819 = vmatpush.msrb.mxu1 %v2397_v50 }
 0x1cb   : > { %1848 = vmatpush.msra.mxu2 %v2388_v3  ;;  %1868 = vmatpush.msra.mxu3 %v2389_v10 }
 0x1cc   : > { %1800 = vmatpush.msrb.mxu0 %v2394_v1  ;;  %1820 = vmatpush.msrb.mxu1 %v2395_v8  ;;  %v1907_v1 = vld [vmem:[%s4007_s5 + $0x38] sm:$0xff]  ;;  %v2419_v8 = vld [vmem:[%s4007_s5 + $0x90] sm:$0xff] }
 0x1cd   : > { %1849 = vmatpush.msra.mxu2 %v2386_v39  ;;  %1869 = vmatpush.msra.mxu3 %v2387_v40 }
 0x1ce   : > { %1801 = vmatpush.msrb.mxu0 %v2392_v2  ;;  %1821 = vmatpush.msrb.mxu1 %v2393_v9  ;;  %v2430_v2 = vld [vmem:[%s4007_s5 + $0xe0] sm:$0xff]  ;;  %v2441_v9 = vld [vmem:[%s4007_s5 + $0x130] sm:$0xff] }
 0x1cf   : > { %1850 = vmatpush.msra.mxu2 %v2384_v5  ;;  %1870 = vmatpush.msra.mxu3 %v2385_v11 }
 0x1d0   : > { %1802 = vmatpush.msrb.mxu0 %v2390_v25  ;;  %1822 = vmatpush.msrb.mxu1 %v2391_v32  ;;  %v1906_v25 = vld [vmem:[%s4007_s5 + $0x30] sm:$0xff]  ;;  %v2418_v32 = vld [vmem:[%s4007_s5 + $0x88] sm:$0xff] }
 0x1d1   : > { %1851 = vmatpush.msra.mxu2 %v2382_v51  ;;  %1871 = vmatpush.msra.mxu3 %v2383_v53 }
 0x1d2   : > { %1803 = vmatpush.msrb.mxu0 %v2388_v3  ;;  %1823 = vmatpush.msrb.mxu1 %v2389_v10  ;;  %v2429_v3 = vld [vmem:[%s4007_s5 + $0xd8] sm:$0xff]  ;;  %v2440_v10 = vld [vmem:[%s4007_s5 + $0x128] sm:$0xff] }
 0x1d3   : > { %1852 = vmatpush.msra.mxu2 %v2380_v13  ;;  %1872 = vmatpush.msra.mxu3 %v2381_v57 }
 0x1d4   : > { %1804 = vmatpush.msrb.mxu0 %v2386_v39  ;;  %1824 = vmatpush.msrb.mxu1 %v2387_v40  ;;  %v1905_v39 = vld [vmem:[%s4007_s5 + $0x28] sm:$0xff]  ;;  %v2417_v40 = vld [vmem:[%s4007_s5 + $0x80] sm:$0xff] }
 0x1d5   : > { %1853 = vmatpush.msra.mxu2 %v2378_v58  ;;  %1873 = vmatpush.msra.mxu3 %v2379_v59 }
 0x1d6   : > { %1805 = vmatpush.msrb.mxu0 %v2384_v5  ;;  %1825 = vmatpush.msrb.mxu1 %v2385_v11  ;;  %v2428_v5 = vld [vmem:[%s4007_s5 + $0xd0] sm:$0xff]  ;;  %v2439_v11 = vld [vmem:[%s4007_s5 + $0x120] sm:$0xff] }
 0x1d7   : > { %1854 = vmatpush.msra.mxu2 %v2376_v33  ;;  %1874 = vmatpush.msra.mxu3 %v2377_v36 }
 0x1d8   : > { %2408 = vmatmul.msk.f32.vlgmr.msra.gmra.mxu2 %vm1357_vm3, %v1836_v4  ;;  %2409 = vmatmul.msk.f32.vlgmr.msra.gmra.mxu3 %vm1357_vm3, %v1836_v4  ;;  %v1902_v4 = vld [vmem:[%s4007_s5 + $0x10] sm:$0xff] }
 0x1d9   : > { %1806 = vmatpush.msrb.mxu0 %v2382_v51  ;;  %1826 = vmatpush.msrb.mxu1 %v2383_v53  ;;  %v1904_v51 = vld [vmem:[%s4007_s5 + $0x20] sm:$0xff]  ;;  %v2416_v53 = vld [vmem:[%s4007_s5 + $0x78] sm:$0xff] }
 0x1da   : > { %1990 = vmatpush.msrb.mxu2 %v2431_v29  ;;  %2025 = vmatpush.msrb.mxu3 %v2442_v60  ;;  %v2422_v29 = vld [vmem:[%s4007_s5 + $0xa0] sm:$0xff]  ;;  %v2433_v60 = vld [vmem:[%s4007_s5 + $0xf0] sm:$0xff] }
 0x1db   : > { %1807 = vmatpush.msrb.mxu0 %v2380_v13  ;;  %1827 = vmatpush.msrb.mxu1 %v2381_v57  ;;  %v2427_v13 = vld [vmem:[%s4007_s5 + $0xc8] sm:$0xff]  ;;  %v2438_v57 = vld [vmem:[%s4007_s5 + $0x118] sm:$0xff] }
 0x1dc   : > { %1991 = vmatpush.msrb.mxu2 %v2430_v2  ;;  %2026 = vmatpush.msrb.mxu3 %v2441_v9 }
 0x1dd   : > { %1808 = vmatpush.msrb.mxu0 %v2378_v58  ;;  %1828 = vmatpush.msrb.mxu1 %v2379_v59  ;;  %v1903_v58 = vld [vmem:[%s4007_s5 + $0x18] sm:$0xff]  ;;  %v2415_v59 = vld [vmem:[%s4007_s5 + $0x70] sm:$0xff] }
 0x1de   : > { %1992 = vmatpush.msrb.mxu2 %v2429_v3  ;;  %2027 = vmatpush.msrb.mxu3 %v2440_v10 }
 0x1df   : > { %1809 = vmatpush.msrb.mxu0 %v2376_v33  ;;  %1829 = vmatpush.msrb.mxu1 %v2377_v36  ;;  %v2426_v33 = vld [vmem:[%s4007_s5 + $0xc0] sm:$0xff]  ;;  %v2437_v36 = vld [vmem:[%s4007_s5 + $0x110] sm:$0xff] }
 0x1e0   : > { %2406 = vmatmul.msk.f32.vlgmr.msrb.gmra.mxu0 %vm1357_vm3, %v3709_v35  ;;  %2407 = vmatmul.msk.f32.vlgmr.msrb.gmra.mxu1 %vm1357_vm3, %v3709_v35 }
 0x1e1   : > { %1920 = vmatpush.msra.mxu0 %v1909_v21  ;;  %1955 = vmatpush.msra.mxu1 %v2420_v55  ;;  %v1900_v21 = vld [vmem:[%s4007_s5] sm:$0xff]  ;;  %v2423_v55 = vld [vmem:[%s4007_s5 + $0xa8] sm:$0xff] }
 0x1e2   : > { %1993 = vmatpush.msrb.mxu2 %v2428_v5  ;;  %2028 = vmatpush.msrb.mxu3 %v2439_v11 }
 0x1e3   : > { %1921 = vmatpush.msra.mxu0 %v1908_v54  ;;  %1956 = vmatpush.msra.mxu1 %v2419_v8  ;;  %v2412_v54 = vld [vmem:[%s4007_s5 + $0x58] sm:$0xff] }
 0x1e4   : > { %1994 = vmatpush.msrb.mxu2 %v2427_v13  ;;  %2029 = vmatpush.msrb.mxu3 %v2438_v57 }
 0x1e5   : > { %1922 = vmatpush.msra.mxu0 %v1907_v1  ;;  %1957 = vmatpush.msra.mxu1 %v2418_v32 }
 0x1e6   : > { %1995 = vmatpush.msrb.mxu2 %v2426_v33  ;;  %2030 = vmatpush.msrb.mxu3 %v2437_v36 }
 0x1e7   : > { %1923 = vmatpush.msra.mxu0 %v1906_v25  ;;  %1958 = vmatpush.msra.mxu1 %v2417_v40 }
 0x1e9   : > { %1924 = vmatpush.msra.mxu0 %v1905_v39  ;;  %1959 = vmatpush.msra.mxu1 %v2416_v53 }
 0x1eb   : > { %1925 = vmatpush.msra.mxu0 %v1904_v51  ;;  %1960 = vmatpush.msra.mxu1 %v2415_v59 }
 0x1ed   : > { %1926 = vmatpush.msra.mxu0 %v1903_v58 }
 0x1ef   : > { %1927 = vmatpush.msra.mxu0 %v1902_v4 }
 0x1f9   : > { %v1421_v0 = vpop.f32.mrf.mxu2  ;;  %v1441_v47 = vpop.f32.mrf.mxu3 }
 0x1fd   : > { %v1378_v62 = vpop.f32.mrf.mxu0  ;;  %v1398_v63 = vpop.f32.mrf.mxu1 }
 0x1fe   : > { %v1422_v15 = vadd.f32 %v1421_v0, %v1378_v62  ;;  %v1442_v30 = vadd.f32 %v1441_v47, %v1398_v63  ;;  %v2414_v0 = vld [vmem:[%s4007_s5 + $0x68] sm:$0xff]  ;;  %v2425_v62 = vld [vmem:[%s4007_s5 + $0xb8] sm:$0xff] }
 0x1ff   : > { %1961 = vmatpush.msra.mxu1 %v2414_v0  ;;  %v2436_v63 = vld [vmem:[%s4007_s5 + $0x108] sm:$0xff]  ;;  %1996 = vmatpush.msrb.mxu2 %v2425_v62 }
 0x200   : > { %2031 = vmatpush.msrb.mxu3 %v2436_v63  ;;  %v1901_v47 = vld [vmem:[%s4007_s5 + $0x8] sm:$0xff] }
 0x201   : > { %1928 = vmatpush.msra.mxu0 %v1901_v47 }
 0x203   : > { %1929 = vmatpush.msra.mxu0 %v1900_v21 }
 0x204   : > { %v1504_v48 = vpop.f32.mrf.mxu2  ;;  %v1524_v24 = vpop.f32.mrf.mxu3 }
 0x206   : > { %v1464_v12 = vpop.f32.mrf.mxu0  ;;  %v1484_v7 = vpop.f32.mrf.mxu1 }
 0x207   : > { %v1505_v16 = vadd.f32 %v1504_v48, %v1464_v12  ;;  %v1525_v35 = vadd.f32 %v1524_v24, %v1484_v7  ;;  %v2413_v48 = vld [vmem:[%s4007_s5 + $0x60] sm:$0xff]  ;;  %v2424_v12 = vld [vmem:[%s4007_s5 + $0xb0] sm:$0xff]  ;;  %v2434_v24 = vld [vmem:[%s4007_s5 + $0xf8] sm:$0xff] }
 0x208   : > { %1962 = vmatpush.msra.mxu1 %v2413_v48  ;;  %v2435_v7 = vld [vmem:[%s4007_s5 + $0x100] sm:$0xff]  ;;  %1997 = vmatpush.msrb.mxu2 %v2424_v12 }
 0x209   : > { %2032 = vmatpush.msrb.mxu3 %v2435_v7 }
 0x20a   : > { %1963 = vmatpush.msra.mxu1 %v2412_v54  ;;  %1998 = vmatpush.msrb.mxu2 %v2423_v55 }
 0x20b   : > { %2033 = vmatpush.msrb.mxu3 %v2434_v24 }
 0x20c   : > { %1999 = vmatpush.msrb.mxu2 %v2422_v29 }
 0x20d   : > { %2034 = vmatpush.msrb.mxu3 %v2433_v60 }
 0x21b   : > { %v1620_v56 = vpop.f32.mrf.mxu2  ;;  %v1640_v6 = vpop.f32.mrf.mxu3 }
 0x21c   : > { %v1643_v18 = vadd.f32 %v1620_v56, %v1505_v16  ;;  %v1644_v41 = vadd.f32 %v1640_v6, %v1525_v35  ;;  %v2411_v56 = vld [vmem:[%s4007_s5 + $0x50] sm:$0xff] }
 0x21d   : > { %1964 = vmatpush.msra.mxu1 %v2411_v56 }
 0x21e   : > { %v1575_v61 = vpop.f32.mrf.mxu0  ;;  %v1595_v43 = vpop.f32.mrf.mxu1 }
 0x21f   : > { %v1598_v19 = vadd.f32 %v1575_v61, %v1422_v15  ;;  %v1599_v37 = vadd.f32 %v1595_v43, %v1442_v30  ;;  %v2491_v43 = vld [vmem:[%s4006_s4] ss:$0 sm:$0xff]  ;;  %v2042_v30 = vld [vmem:[%s4009_s7 + $0x8] sm:$0xff] }
 0x23b   : > { %v1738_v46 = vpop.f32.mrf.mxu2  ;;  %v1758_v20 = vpop.f32.mrf.mxu3 }
 0x23c   : > { %v1761_v23 = vadd.f32 %v1738_v46, %v1643_v18  ;;  %v1762_v45 = vadd.f32 %v1758_v20, %v1644_v41  ;;  %v2047_v20 = vld [vmem:[%s4009_s7 + $0x30] sm:$0x3] }
 0x23d   : > { %2444 = vmatpush.msk.msrb.mxu0 %vm2053_vm6, %v2047_v20 }
 0x23e   : > { %v1693_v14 = vpop.f32.mrf.mxu0  ;;  %v1713_v17 = vpop.f32.mrf.mxu1 }
 0x23f   : > { %v1716_v26 = vadd.f32 %v1693_v14, %v1598_v19  ;;  %v1717_v42 = vadd.f32 %v1713_v17, %v1599_v37 }
 0x25b   : > { %v1856_v22 = vpop.f32.mrf.mxu2  ;;  %v1876_v44 = vpop.f32.mrf.mxu3 }
 0x25c   : > { %v1879_v31 = vadd.f32 %v1856_v22, %v1761_v23  ;;  %v1880_v52 = vadd.f32 %v1876_v44, %v1762_v45  ;;  %v2046_v22 = vld [vmem:[%s4009_s7 + $0x28] sm:$0xff]  ;;  %v2045_v23 = vld [vmem:[%s4009_s7 + $0x20] sm:$0xff] }
 0x25d   : > { %v1811_v28 = vpop.f32.mrf.mxu0  ;;  %v1831_v27 = vpop.f32.mrf.mxu1  ;;  %2067 = vmatpush.msrb.mxu0 %v2046_v22 }
 0x25e   : > { %v1834_v34 = vadd.f32 %v1811_v28, %v1716_v26  ;;  %v1835_v49 = vadd.f32 %v1831_v27, %v1717_v42  ;;  %v2044_v26 = vld [vmem:[%s4009_s7 + $0x18] sm:$0xff]  ;;  %v2043_v28 = vld [vmem:[%s4009_s7 + $0x10] sm:$0xff] }
 0x25f   : > { %2068 = vmatpush.msrb.mxu0 %v2045_v23 }
 0x260   : > { %v3831_v38 = vmax.f32 %v1834_v34, %v1879_v31  ;;  %v1882_v50 = vmax.f32 %v1835_v49, %v1880_v52  ;;  %v2041_v31 = vld [vmem:[%s4009_s7] sm:$0xff] }
 0x261   : > { %2069 = vmatpush.msrb.mxu0 %v2044_v26  ;;  %v1899_v34 = vld [vmem:[%s4008_s6] sm:$0x1] }
 0x262   : > { %1885 = vrot.lane.b32.xlu2 %v3831_v38, %s2557_s16  ;;  %v2048_v52 = vld [vmem:[%s4010_s8] sm:$0x1] }
 0x263   : > { %2070 = vmatpush.msrb.mxu0 %v2043_v28 }
 0x265   : > { %2071 = vmatpush.msrb.mxu0 %v2042_v30 }
 0x267   : > { %2072 = vmatpush.msrb.mxu0 %v2041_v31 }
 0x26a   : > { %1887 = vrot.lane.b32.xlu2 %v1882_v50, %s2557_s16  ;;  %s2089_s16 = sshll.u32 %s324_s24, 4  ;;  %s2090_s16 = int_to_ptr.vmem [resolvable:$true] %s2089_s16 }
 0x2bc   : > { %v1886_v61 = vpop.permute.xlu2 %1885 }
 0x2c4   : > { %v1888_v6 = vpop.permute.xlu2 %1887 }
 0x2c5   : > { %v1890_v46 = vsel %vm1889_vm4, %v1886_v61, %v1888_v6 }
 0x2c6   : > { %v1892_v14 = vmax.f32 %v3831_v38, %v1890_v46 }
 0x2c8   : > { %v1897_v15 = vadd.f32 %v2491_v43, %v1892_v14 }
 0x2ca   : > { %v1898_v16 = vmax.f32 %v1897_v15, 0.0 }
 0x2cc   : > { %2410 = vmatmul.msk.f32.vlgmr.msra.gmra.mxu0 %vm1910_vm5, %v1898_v16  ;;  %v1946_v17 = vrot.slane %v1898_v16, 1  ;;  %v1981_v18 = vrot.slane %v1898_v16, 2  ;;  %v2016_v19 = vrot.slane %v1898_v16, 3 }
 0x2ce   : > { %2421 = vmatmul.msk.f32.vlgmr.msra.gmra.mxu1 %vm1910_vm5, %v1946_v17  ;;  %2432 = vmatmul.msk.f32.vlgmr.msrb.gmra.mxu2 %vm1910_vm5, %v1981_v18 }
 0x2cf   : > { %2443 = vmatmul.msk.f32.vlgmr.msrb.gmra.mxu3 %vm1910_vm5, %v2016_v19 }
 0x349   : > { %v1931_v35 = vpop.f32.mrf.mxu0 }
 0x34a   : > { %v1934_v37 = vadd.f32 %v1931_v35, %v1899_v34 }
 0x34b   : > { %v1966_v38 = vpop.f32.mrf.mxu1 }
 0x34c   : > { %v1969_v27 = vadd.f32 %v1966_v38, %v1934_v37 }
 0x351   : > { %v2001_v41 = vpop.f32.mrf.mxu2 }
 0x352   : > { %v2004_v42 = vadd.f32 %v2001_v41, %v1969_v27  ;;  %v2036_v44 = vpop.f32.mrf.mxu3 }
 0x354   : > { %v2039_v45 = vadd.f32 %v2036_v44, %v2004_v42 }
 0x356   : > { %v2040_v49 = vmax.f32 %v2039_v45, 0.0 }
 0x358   : > { %2445 = vmatmul.msk.f32.vlgmr.msrb.gmra.mxu0 %vm2049_vm7, %v2040_v49 }
 0x3d5   : > { %v2074_v50 = vpop.f32.mrf.mxu0 }
 0x3d6   : > { %v2075_v1 = vadd.f32 %v2074_v50, %v2048_v52 }
 0x3d8   : > { %2077 = vst [vmem:[%s324_s24] sm:$0x1] %v2075_v1 }
 0x3d9   : > { %2519 = shalt.err (!%p2516_p3)
}
 0x3da   : > { %2449 = dma.vmem_to_hbm [thread:$0]  (%p2646_p5), %s2090_s16, 16, %s2092_s17, %s2079_s21  }
 0x3db PF: > { %p2455_p4 = scmp.ge.s32.totalorder %s2554_s12, 2  ;;  %s2103_s26 = sand.u32 1, %s2542_s30  }
 0x3dc   : > { %s2104_s28 = scalar_lea.sflag [#allocation3], %s2103_s26 }
 0x3dd   : > { %p2452_p7 = pnand %p2455_p4, %p2650_p6 }
 0x3df   : > { %p2453_p8 = pneg %p2452_p7 }
 0x3e1   : > { %2537 = dma.done.wait (%p2453_p8), %s2104_s28, 16  }
 0x3e2   : > { %2539 = vsyncadd (%p2453_p8), %s2104_s28, 4294967280  ;;  %p19_p9 = scmp.ge.s32.totalorder %s2633_s15, 4   ;;  %s4014_s30 = smov %s2546_s10 }
 0x3e3   : > { %s4015_s10 = smov %s2550_s11  ;;  %s4016_s11 = smov %s2644_s18 }
 0x3e4   : > { %s4017_s12 = smov %s2633_s15  ;;  %21 = sbr.rel (!%p19_p9) target bundleno = 3 (0x3), region = 105 }
 0x3e9   :  { %2109 = vsyncpa [#allocation3], 1 }
 0x3ea   :  { %2111 = vsyncpa [#allocation3 + $0x1], 1 }

</bundles_post_ra>
